<compile_context>
chip_gen: v7x
topology: tpu7x:2x2x1
jax: 0.10.0
libtpu: 0.0.40
codegen_flags: <defaults>
</compile_context>

<pallas_src>
import functools

import jax
import jax.numpy as jnp
from jax.experimental import pallas as pl
from jax.experimental.pallas import tpu as pltpu


def _pick_tile_h(H):
    for cand in (64, 32, 16, 8, 4, 2, 1):
        if cand <= H and H % cand == 0:
            return cand
    return H


def _double_conv_kernel(xpad_ref, w1_ref, b1_ref, w2_ref, b2_ref, o_ref, y1_ref,
                        *, H, W, cin, cmid, cout, tile_h, compute_dtype):
    # xpad_ref: (1, H+4, W+2, cin)   zero-padded input (2 rows / 1 col halo per side)
    # w1_ref:   (9*cin,  cmid)       stage-1 weights, BN scale folded, K order = (dy, dx, cin)
    # b1_ref:   (1, cmid)            stage-1 folded bias (conv bias + BN), f32
    # w2_ref:   (9*cmid, cout)       stage-2 weights, BN scale folded
    # b2_ref:   (1, cout)
    # o_ref:    (1, tile_h, W, cout)
    # y1_ref:   (tile_h+2, W+2, cmid) f32 VMEM scratch: stage-1 activation + zero halo
    t = pl.program_id(1)
    r0 = pl.multiple_of(t * tile_h, tile_h)      # first output row of this tile
    th1 = tile_h + 2                             # stage-1 rows incl. stage-2 halo rows

    def im2col(load_slab, rows, ci):
        # Build the (rows*W, 9*ci) patch slab; K ordered as (dy, dx, ci) to match the
        # wrapper's weight reshape.
        cols = []
        for dy in range(3):
            for dx in range(3):
                cols.append(load_slab(dy, dx).reshape(rows * W, ci))
        return jnp.concatenate(cols, axis=-1)

    # ---- stage 1: conv3x3(cin->cmid) + BN + ReLU on rows [r0-1, r0+tile_h] -------------
    p1 = im2col(lambda dy, dx: xpad_ref[0, pl.ds(r0 + dy, th1), pl.ds(dx, W), :],
                th1, cin)                                        # (th1*W, 9*cin)
    acc1 = jnp.dot(p1, w1_ref[...], preferred_element_type=jnp.float32)
    y1 = jnp.maximum(acc1 + b1_ref[...], 0.0)                    # f32 epilogue
    y1 = y1.reshape(th1, W, cmid)
    # Rows outside the image are the second conv's zero-padding rows -> force them to 0.
    row = r0 - 1 + jax.lax.broadcasted_iota(jnp.int32, (th1, 1, 1), 0)
    y1 = jnp.where((row >= 0) & (row < H), y1, jnp.zeros_like(y1))
    # Stage-1 activation stays in VMEM (fused); zero the W-halo columns explicitly.
    zero_col = jnp.zeros((th1, 1, cmid), jnp.float32)
    y1_ref[:, 0:1, :] = zero_col
    y1_ref[:, W + 1:W + 2, :] = zero_col
    y1_ref[:, pl.ds(1, W), :] = y1

    # ---- stage 2: conv3x3(cmid->cout) + BN + ReLU on rows [r0, r0+tile_h) ---------------
    p2 = im2col(lambda dy, dx: y1_ref[pl.ds(dy, tile_h), pl.ds(dx, W), :],
                tile_h, cmid).astype(compute_dtype)              # (tile_h*W, 9*cmid)
    acc2 = jnp.dot(p2, w2_ref[...], preferred_element_type=jnp.float32)
    y2 = jnp.maximum(acc2 + b2_ref[...], 0.0)                    # f32 epilogue
    o_ref[0] = y2.reshape(tile_h, W, cout).astype(o_ref.dtype)


def double_conv_apply(x_nhwc, params, *, tile_h=None, compute_dtype=jnp.bfloat16):
    """Fused (conv3x3 pad=1 -> BatchNorm(eval) -> ReLU) x 2 on an NHWC input."""
    (w1, scale1, bias1), (w2, scale2, bias2) = params
    N, H, W, cin = x_nhwc.shape
    cmid = w1.shape[-1]
    cout = w2.shape[-1]
    assert w1.shape == (3, 3, cin, cmid) and w2.shape == (3, 3, cmid, cout)
    assert W % 8 == 0, "W must be a multiple of 8 (sublane-aligned im2col reshapes)"
    if tile_h is None:
        tile_h = _pick_tile_h(H)
    assert H % tile_h == 0, "tile_h must divide H"

    # Fold the eval-mode BatchNorm scale into the conv weights; reshape to im2col layout.
    w1f = (w1 * scale1).reshape(9 * cin, cmid).astype(compute_dtype)
    w2f = (w2 * scale2).reshape(9 * cmid, cout).astype(compute_dtype)
    b1 = bias1.reshape(1, cmid).astype(jnp.float32)
    b2 = bias2.reshape(1, cout).astype(jnp.float32)

    # 2 rows / 1 col of zero halo: enough context to also produce the one stage-1 halo row
    # that the second conv needs at each H-tile edge.
    xpad = jnp.pad(x_nhwc, ((0, 0), (2, 2), (1, 1), (0, 0))).astype(compute_dtype)

    kernel = functools.partial(
        _double_conv_kernel, H=H, W=W, cin=cin, cmid=cmid, cout=cout,
        tile_h=tile_h, compute_dtype=compute_dtype)

    return pl.pallas_call(
        kernel,
        out_shape=jax.ShapeDtypeStruct((N, H, W, cout), x_nhwc.dtype),
        grid_spec=pltpu.PrefetchScalarGridSpec(
            num_scalar_prefetch=0,
            grid=(N, H // tile_h),
            in_specs=[
                pl.BlockSpec((1, H + 4, W + 2, cin), lambda n, t: (n, 0, 0, 0)),
                pl.BlockSpec((9 * cin, cmid), lambda n, t: (0, 0)),
                pl.BlockSpec((1, cmid), lambda n, t: (0, 0)),
                pl.BlockSpec((9 * cmid, cout), lambda n, t: (0, 0)),
                pl.BlockSpec((1, cout), lambda n, t: (0, 0)),
            ],
            out_specs=pl.BlockSpec((1, tile_h, W, cout), lambda n, t: (n, t, 0, 0)),
            scratch_shapes=[pltpu.VMEM((tile_h + 2, W + 2, cmid), jnp.float32)],
        ),
        compiler_params=pltpu.CompilerParams(
            dimension_semantics=("parallel", "parallel"),
            vmem_limit_bytes=48 * 1024 * 1024),
    )(xpad, w1f, b1, w2f, b2)


def inconv_forward(x_nchw, params, *, tile_h=None, compute_dtype=jnp.bfloat16):
    """inconv.forward: NCHW in, NCHW out (the kernel runs NHWC internally)."""
    y = jnp.transpose(x_nchw, (0, 2, 3, 1))          # NCHW -> NHWC
    y = double_conv_apply(y, params, tile_h=tile_h, compute_dtype=compute_dtype)
    return jnp.transpose(y, (0, 3, 1, 2))            # NHWC -> NCHW


def init_params(key, in_ch, out_ch, eps=1e-5):
    """Deterministic synthetic parameters for the two conv/BN stages (eval-mode BN)."""
    params = []
    for (ci, co) in [(in_ch, out_ch), (out_ch, out_ch)]:
        key, k1, k2 = jax.random.split(key, 3)
        w = jax.random.normal(k1, (3, 3, ci, co), jnp.float32) * 0.1   # HWIO
        conv_b = jax.random.normal(k2, (co,), jnp.float32) * 0.1
        gamma = 1.0 + 0.05 * jnp.arange(co, dtype=jnp.float32)
        beta = 0.02 * jnp.arange(co, dtype=jnp.float32)
        running_mean = 0.01 * jnp.arange(co, dtype=jnp.float32)
        running_var = 1.0 + 0.1 * jnp.arange(co, dtype=jnp.float32)
        scale = gamma / jnp.sqrt(running_var + eps)
        bias = (conv_b - running_mean) * scale + beta
        params.append((w, scale, bias))
    return params


def _ref_forward(x_nhwc, params):
    """Pure-JAX reference (XLA conv, f32) for the correctness check."""
    y = x_nhwc
    for w, scale, bias in params:
        y = jax.lax.conv_general_dilated(
            y, w, window_strides=(1, 1), padding='SAME',
            dimension_numbers=('NHWC', 'HWIO', 'NHWC'))
        y = jnp.maximum(y * scale + bias, 0.0)
    return y


if __name__ == "__main__":
    key = jax.random.PRNGKey(0)
    key, kx = jax.random.split(key)
    N, Cin, H, W = 2, 4, 16, 16
    Cout = 8
    x_nchw = jax.random.normal(kx, (N, Cin, H, W), jnp.float32)
    params = init_params(key, Cin, Cout)

    # XLA reference in f32.
    x_nhwc = jnp.transpose(x_nchw, (0, 2, 3, 1))
    ref_nchw = jnp.transpose(_ref_forward(x_nhwc, params), (0, 3, 1, 2))

    # 1) f32 compute path: exact-precision check (tile_h=8 -> 2 H-tiles, exercises halos).
    out_f32 = inconv_forward(x_nchw, params, tile_h=8, compute_dtype=jnp.float32)
    out_f32 = jax.block_until_ready(out_f32)
    assert out_f32.shape == (N, Cout, H, W)
    assert out_f32.dtype == jnp.float32
    assert jnp.allclose(out_f32, ref_nchw, atol=1e-4, rtol=1e-4)

    # 2) default bf16 MXU path (f32 accumulate + f32 epilogue): loose numerical check.
    out_bf16 = jax.block_until_ready(inconv_forward(x_nchw, params, tile_h=8))
    assert out_bf16.shape == (N, Cout, H, W)
    assert jnp.allclose(out_bf16, ref_nchw, atol=1e-1, rtol=1e-1)

    print("KERNEL_OK")
</pallas_src>

<mosaic_0001>
module attributes {stable_mosaic.version = 11 : i64} {
  func.func @_double_conv_kernel(%arg0: i32, %arg1: i32, %arg2: memref<1x20x18x4xf32, #tpu.memory_space<vmem>>, %arg3: memref<36x8xf32, #tpu.memory_space<vmem>>, %arg4: memref<1x8xf32, #tpu.memory_space<vmem>>, %arg5: memref<72x8xf32, #tpu.memory_space<vmem>>, %arg6: memref<1x8xf32, #tpu.memory_space<vmem>>, %arg7: memref<1x8x16x8xf32, #tpu.memory_space<vmem>>, %arg8: memref<10x18x8xf32, #tpu.memory_space<vmem>>) attributes {dimension_semantics = [#tpu.dimension_semantics<parallel>, #tpu.dimension_semantics<parallel>], iteration_bounds = array<i64: 2, 2>, scalar_prefetch = 0 : i64, scratch_operands = 1 : i64, tpu.core_type = #tpu.core_type<tc>, window_params = [{transform_indices = @transform_0, window_bounds = array<i64: 1, 20, 18, 4>}, {pipeline_mode = #tpu.pipeline_mode<synchronous>, transform_indices = @transform_1, window_bounds = array<i64: 36, 8>}, {pipeline_mode = #tpu.pipeline_mode<synchronous>, transform_indices = @transform_2, window_bounds = array<i64: 1, 8>}, {pipeline_mode = #tpu.pipeline_mode<synchronous>, transform_indices = @transform_3, window_bounds = array<i64: 72, 8>}, {pipeline_mode = #tpu.pipeline_mode<synchronous>, transform_indices = @transform_4, window_bounds = array<i64: 1, 8>}, {transform_indices = @transform_5, window_bounds = array<i64: 1, 8, 16, 8>}]} {
    %c8_i32 = arith.constant 8 : i32
    %0 = arith.muli %arg1, %c8_i32 : i32
    %1 = tpu.assume_multiple %0, 8 : i32
    %c0_i32 = arith.constant 0 : i32
    %2 = arith.addi %1, %c0_i32 : i32
    %c0 = arith.constant 0 : index
    %3 = arith.index_cast %2 : i32 to index
    %c0_0 = arith.constant 0 : index
    %c0_1 = arith.constant 0 : index
    %4 = vector.load %arg2[%c0, %3, %c0_0, %c0_1] : memref<1x20x18x4xf32, #tpu.memory_space<vmem>>, vector<1x10x16x4xf32>
    %5 = vector.shape_cast %4 : vector<1x10x16x4xf32> to vector<10x16x4xf32>
    %6 = vector.shape_cast %5 : vector<10x16x4xf32> to vector<160x4xf32>
    %c0_i32_2 = arith.constant 0 : i32
    %7 = arith.addi %1, %c0_i32_2 : i32
    %c0_3 = arith.constant 0 : index
    %8 = arith.index_cast %7 : i32 to index
    %c1 = arith.constant 1 : index
    %c0_4 = arith.constant 0 : index
    %9 = vector.load %arg2[%c0_3, %8, %c1, %c0_4] : memref<1x20x18x4xf32, #tpu.memory_space<vmem>>, vector<1x10x16x4xf32>
    %10 = vector.shape_cast %9 : vector<1x10x16x4xf32> to vector<10x16x4xf32>
    %11 = vector.shape_cast %10 : vector<10x16x4xf32> to vector<160x4xf32>
    %c0_i32_5 = arith.constant 0 : i32
    %12 = arith.addi %1, %c0_i32_5 : i32
    %c0_6 = arith.constant 0 : index
    %13 = arith.index_cast %12 : i32 to index
    %c2 = arith.constant 2 : index
    %c0_7 = arith.constant 0 : index
    %14 = vector.load %arg2[%c0_6, %13, %c2, %c0_7] : memref<1x20x18x4xf32, #tpu.memory_space<vmem>>, vector<1x10x16x4xf32>
    %15 = vector.shape_cast %14 : vector<1x10x16x4xf32> to vector<10x16x4xf32>
    %16 = vector.shape_cast %15 : vector<10x16x4xf32> to vector<160x4xf32>
    %c1_i32 = arith.constant 1 : i32
    %17 = arith.addi %1, %c1_i32 : i32
    %c0_8 = arith.constant 0 : index
    %18 = arith.index_cast %17 : i32 to index
    %c0_9 = arith.constant 0 : index
    %c0_10 = arith.constant 0 : index
    %19 = vector.load %arg2[%c0_8, %18, %c0_9, %c0_10] : memref<1x20x18x4xf32, #tpu.memory_space<vmem>>, vector<1x10x16x4xf32>
    %20 = vector.shape_cast %19 : vector<1x10x16x4xf32> to vector<10x16x4xf32>
    %21 = vector.shape_cast %20 : vector<10x16x4xf32> to vector<160x4xf32>
    %c1_i32_11 = arith.constant 1 : i32
    %22 = arith.addi %1, %c1_i32_11 : i32
    %c0_12 = arith.constant 0 : index
    %23 = arith.index_cast %22 : i32 to index
    %c1_13 = arith.constant 1 : index
    %c0_14 = arith.constant 0 : index
    %24 = vector.load %arg2[%c0_12, %23, %c1_13, %c0_14] : memref<1x20x18x4xf32, #tpu.memory_space<vmem>>, vector<1x10x16x4xf32>
    %25 = vector.shape_cast %24 : vector<1x10x16x4xf32> to vector<10x16x4xf32>
    %26 = vector.shape_cast %25 : vector<10x16x4xf32> to vector<160x4xf32>
    %c1_i32_15 = arith.constant 1 : i32
    %27 = arith.addi %1, %c1_i32_15 : i32
    %c0_16 = arith.constant 0 : index
    %28 = arith.index_cast %27 : i32 to index
    %c2_17 = arith.constant 2 : index
    %c0_18 = arith.constant 0 : index
    %29 = vector.load %arg2[%c0_16, %28, %c2_17, %c0_18] : memref<1x20x18x4xf32, #tpu.memory_space<vmem>>, vector<1x10x16x4xf32>
    %30 = vector.shape_cast %29 : vector<1x10x16x4xf32> to vector<10x16x4xf32>
    %31 = vector.shape_cast %30 : vector<10x16x4xf32> to vector<160x4xf32>
    %c2_i32 = arith.constant 2 : i32
    %32 = arith.addi %1, %c2_i32 : i32
    %c0_19 = arith.constant 0 : index
    %33 = arith.index_cast %32 : i32 to index
    %c0_20 = arith.constant 0 : index
    %c0_21 = arith.constant 0 : index
    %34 = vector.load %arg2[%c0_19, %33, %c0_20, %c0_21] : memref<1x20x18x4xf32, #tpu.memory_space<vmem>>, vector<1x10x16x4xf32>
    %35 = vector.shape_cast %34 : vector<1x10x16x4xf32> to vector<10x16x4xf32>
    %36 = vector.shape_cast %35 : vector<10x16x4xf32> to vector<160x4xf32>
    %c2_i32_22 = arith.constant 2 : i32
    %37 = arith.addi %1, %c2_i32_22 : i32
    %c0_23 = arith.constant 0 : index
    %38 = arith.index_cast %37 : i32 to index
    %c1_24 = arith.constant 1 : index
    %c0_25 = arith.constant 0 : index
    %39 = vector.load %arg2[%c0_23, %38, %c1_24, %c0_25] : memref<1x20x18x4xf32, #tpu.memory_space<vmem>>, vector<1x10x16x4xf32>
    %40 = vector.shape_cast %39 : vector<1x10x16x4xf32> to vector<10x16x4xf32>
    %41 = vector.shape_cast %40 : vector<10x16x4xf32> to vector<160x4xf32>
    %c2_i32_26 = arith.constant 2 : i32
    %42 = arith.addi %1, %c2_i32_26 : i32
    %c0_27 = arith.constant 0 : index
    %43 = arith.index_cast %42 : i32 to index
    %c2_28 = arith.constant 2 : index
    %c0_29 = arith.constant 0 : index
    %44 = vector.load %arg2[%c0_27, %43, %c2_28, %c0_29] : memref<1x20x18x4xf32, #tpu.memory_space<vmem>>, vector<1x10x16x4xf32>
    %45 = vector.shape_cast %44 : vector<1x10x16x4xf32> to vector<10x16x4xf32>
    %46 = vector.shape_cast %45 : vector<10x16x4xf32> to vector<160x4xf32>
    %47 = tpu.concatenate %6, %11, %16, %21, %26, %31, %36, %41, %46 in 1 : vector<160x4xf32>, vector<160x4xf32>, vector<160x4xf32>, vector<160x4xf32>, vector<160x4xf32>, vector<160x4xf32>, vector<160x4xf32>, vector<160x4xf32>, vector<160x4xf32> -> vector<160x36xf32>
    %c0_30 = arith.constant 0 : index
    %c0_31 = arith.constant 0 : index
    %48 = vector.load %arg3[%c0_30, %c0_31] : memref<36x8xf32, #tpu.memory_space<vmem>>, vector<36x8xf32>
    %cst = arith.constant dense<0.000000e+00> : vector<160x8xf32>
    %49 = tpu.matmul %47, %48, %cst {dimension_numbers = #tpu.dot_dimension_numbers<[1], [0], [0], [1], [0, 0, 1, 1], [], []>} : vector<160x36xf32>, vector<36x8xf32>, vector<160x8xf32> -> vector<160x8xf32>
    %c0_32 = arith.constant 0 : index
    %c0_33 = arith.constant 0 : index
    %50 = vector.load %arg4[%c0_32, %c0_33] : memref<1x8xf32, #tpu.memory_space<vmem>>, vector<1x8xf32>
    %51 = vector.broadcast %50 : vector<1x8xf32> to vector<160x8xf32>
    %52 = arith.addf %49, %51 : vector<160x8xf32>
    %cst_34 = arith.constant 0.000000e+00 : f32
    %53 = vector.broadcast %cst_34 : f32 to vector<160x8xf32>
    %54 = arith.maximumf %52, %53 : vector<160x8xf32>
    %55 = vector.shape_cast %54 : vector<160x8xf32> to vector<10x16x8xf32>
    %c1_i32_35 = arith.constant 1 : i32
    %56 = arith.subi %1, %c1_i32_35 : i32
    %57 = tpu.iota {dimensions = array<i32: 0>} : vector<10x1x1xi32>
    %58 = vector.broadcast %56 : i32 to vector<10x1x1xi32>
    %59 = arith.addi %58, %57 : vector<10x1x1xi32>
    %c0_i32_36 = arith.constant 0 : i32
    %60 = vector.broadcast %c0_i32_36 : i32 to vector<10x1x1xi32>
    %61 = arith.cmpi sge, %59, %60 : vector<10x1x1xi32>
    %c16_i32 = arith.constant 16 : i32
    %62 = vector.broadcast %c16_i32 : i32 to vector<10x1x1xi32>
    %63 = arith.cmpi slt, %59, %62 : vector<10x1x1xi32>
    %64 = arith.andi %61, %63 : vector<10x1x1xi1>
    %cst_37 = arith.constant 0.000000e+00 : f32
    %65 = vector.broadcast %cst_37 : f32 to vector<10x16x8xf32>
    %66 = vector.shape_cast %64 : vector<10x1x1xi1> to vector<10x1x1xi1>
    %67 = vector.broadcast %66 : vector<10x1x1xi1> to vector<10x16x8xi1>
    %68 = arith.select %67, %55, %65 : vector<10x16x8xi1>, vector<10x16x8xf32>
    %cst_38 = arith.constant 0.000000e+00 : f32
    %69 = vector.broadcast %cst_38 : f32 to vector<10x1x8xf32>
    %c0_39 = arith.constant 0 : index
    %c0_40 = arith.constant 0 : index
    %c0_41 = arith.constant 0 : index
    %70 = vector.load %arg8[%c0_39, %c0_40, %c0_41] : memref<10x18x8xf32, #tpu.memory_space<vmem>>, vector<10x1x8xf32>
    tpu.vector_store %arg8[%c0_39, %c0_40, %c0_41], %69 {strides = array<i32>} : memref<10x18x8xf32, #tpu.memory_space<vmem>>, vector<10x1x8xf32>,
    %c0_42 = arith.constant 0 : index
    %c17 = arith.constant 17 : index
    %c0_43 = arith.constant 0 : index
    %71 = vector.load %arg8[%c0_42, %c17, %c0_43] : memref<10x18x8xf32, #tpu.memory_space<vmem>>, vector<10x1x8xf32>
    tpu.vector_store %arg8[%c0_42, %c17, %c0_43], %69 {strides = array<i32>} : memref<10x18x8xf32, #tpu.memory_space<vmem>>, vector<10x1x8xf32>,
    %c0_44 = arith.constant 0 : index
    %c1_45 = arith.constant 1 : index
    %c0_46 = arith.constant 0 : index
    %72 = vector.load %arg8[%c0_44, %c1_45, %c0_46] : memref<10x18x8xf32, #tpu.memory_space<vmem>>, vector<10x16x8xf32>
    tpu.vector_store %arg8[%c0_44, %c1_45, %c0_46], %68 {strides = array<i32>} : memref<10x18x8xf32, #tpu.memory_space<vmem>>, vector<10x16x8xf32>,
    %c0_47 = arith.constant 0 : index
    %c0_48 = arith.constant 0 : index
    %c0_49 = arith.constant 0 : index
    %73 = vector.load %arg8[%c0_47, %c0_48, %c0_49] : memref<10x18x8xf32, #tpu.memory_space<vmem>>, vector<8x16x8xf32>
    %74 = vector.shape_cast %73 : vector<8x16x8xf32> to vector<128x8xf32>
    %c0_50 = arith.constant 0 : index
    %c1_51 = arith.constant 1 : index
    %c0_52 = arith.constant 0 : index
    %75 = vector.load %arg8[%c0_50, %c1_51, %c0_52] : memref<10x18x8xf32, #tpu.memory_space<vmem>>, vector<8x16x8xf32>
    %76 = vector.shape_cast %75 : vector<8x16x8xf32> to vector<128x8xf32>
    %c0_53 = arith.constant 0 : index
    %c2_54 = arith.constant 2 : index
    %c0_55 = arith.constant 0 : index
    %77 = vector.load %arg8[%c0_53, %c2_54, %c0_55] : memref<10x18x8xf32, #tpu.memory_space<vmem>>, vector<8x16x8xf32>
    %78 = vector.shape_cast %77 : vector<8x16x8xf32> to vector<128x8xf32>
    %c1_56 = arith.constant 1 : index
    %c0_57 = arith.constant 0 : index
    %c0_58 = arith.constant 0 : index
    %79 = vector.load %arg8[%c1_56, %c0_57, %c0_58] : memref<10x18x8xf32, #tpu.memory_space<vmem>>, vector<8x16x8xf32>
    %80 = vector.shape_cast %79 : vector<8x16x8xf32> to vector<128x8xf32>
    %c1_59 = arith.constant 1 : index
    %c1_60 = arith.constant 1 : index
    %c0_61 = arith.constant 0 : index
    %81 = vector.load %arg8[%c1_59, %c1_60, %c0_61] : memref<10x18x8xf32, #tpu.memory_space<vmem>>, vector<8x16x8xf32>
    %82 = vector.shape_cast %81 : vector<8x16x8xf32> to vector<128x8xf32>
    %c1_62 = arith.constant 1 : index
    %c2_63 = arith.constant 2 : index
    %c0_64 = arith.constant 0 : index
    %83 = vector.load %arg8[%c1_62, %c2_63, %c0_64] : memref<10x18x8xf32, #tpu.memory_space<vmem>>, vector<8x16x8xf32>
    %84 = vector.shape_cast %83 : vector<8x16x8xf32> to vector<128x8xf32>
    %c2_65 = arith.constant 2 : index
    %c0_66 = arith.constant 0 : index
    %c0_67 = arith.constant 0 : index
    %85 = vector.load %arg8[%c2_65, %c0_66, %c0_67] : memref<10x18x8xf32, #tpu.memory_space<vmem>>, vector<8x16x8xf32>
    %86 = vector.shape_cast %85 : vector<8x16x8xf32> to vector<128x8xf32>
    %c2_68 = arith.constant 2 : index
    %c1_69 = arith.constant 1 : index
    %c0_70 = arith.constant 0 : index
    %87 = vector.load %arg8[%c2_68, %c1_69, %c0_70] : memref<10x18x8xf32, #tpu.memory_space<vmem>>, vector<8x16x8xf32>
    %88 = vector.shape_cast %87 : vector<8x16x8xf32> to vector<128x8xf32>
    %c2_71 = arith.constant 2 : index
    %c2_72 = arith.constant 2 : index
    %c0_73 = arith.constant 0 : index
    %89 = vector.load %arg8[%c2_71, %c2_72, %c0_73] : memref<10x18x8xf32, #tpu.memory_space<vmem>>, vector<8x16x8xf32>
    %90 = vector.shape_cast %89 : vector<8x16x8xf32> to vector<128x8xf32>
    %91 = tpu.concatenate %74, %76, %78, %80, %82, %84, %86, %88, %90 in 1 : vector<128x8xf32>, vector<128x8xf32>, vector<128x8xf32>, vector<128x8xf32>, vector<128x8xf32>, vector<128x8xf32>, vector<128x8xf32>, vector<128x8xf32>, vector<128x8xf32> -> vector<128x72xf32>
    %c0_74 = arith.constant 0 : index
    %c0_75 = arith.constant 0 : index
    %92 = vector.load %arg5[%c0_74, %c0_75] : memref<72x8xf32, #tpu.memory_space<vmem>>, vector<72x8xf32>
    %cst_76 = arith.constant dense<0.000000e+00> : vector<128x8xf32>
    %93 = tpu.matmul %91, %92, %cst_76 {dimension_numbers = #tpu.dot_dimension_numbers<[1], [0], [0], [1], [0, 0, 1, 1], [], []>} : vector<128x72xf32>, vector<72x8xf32>, vector<128x8xf32> -> vector<128x8xf32>
    %c0_77 = arith.constant 0 : index
    %c0_78 = arith.constant 0 : index
    %94 = vector.load %arg6[%c0_77, %c0_78] : memref<1x8xf32, #tpu.memory_space<vmem>>, vector<1x8xf32>
    %95 = vector.broadcast %94 : vector<1x8xf32> to vector<128x8xf32>
    %96 = arith.addf %93, %95 : vector<128x8xf32>
    %cst_79 = arith.constant 0.000000e+00 : f32
    %97 = vector.broadcast %cst_79 : f32 to vector<128x8xf32>
    %98 = arith.maximumf %96, %97 : vector<128x8xf32>
    %99 = vector.shape_cast %98 : vector<128x8xf32> to vector<8x16x8xf32>
    %c0_80 = arith.constant 0 : index
    %c0_81 = arith.constant 0 : index
    %c0_82 = arith.constant 0 : index
    %c0_83 = arith.constant 0 : index
    %100 = vector.load %arg7[%c0_80, %c0_81, %c0_82, %c0_83] : memref<1x8x16x8xf32, #tpu.memory_space<vmem>>, vector<1x8x16x8xf32>
    %101 = vector.shape_cast %100 : vector<1x8x16x8xf32> to vector<8x16x8xf32>
    %102 = vector.shape_cast %99 : vector<8x16x8xf32> to vector<1x8x16x8xf32>
    tpu.vector_store %arg7[%c0_80, %c0_81, %c0_82, %c0_83], %102 {strides = array<i32>} : memref<1x8x16x8xf32, #tpu.memory_space<vmem>>, vector<1x8x16x8xf32>,
    return
  }
  func.func @transform_0(%arg0: i32, %arg1: i32) -> (i32, i32, i32, i32) {
    %c0_i32 = arith.constant 0 : i32
    %c0_i32_0 = arith.constant 0 : i32
    %c0_i32_1 = arith.constant 0 : i32
    %c0_i32_2 = arith.constant 0 : i32
    return %arg0, %c0_i32, %c0_i32_0, %c0_i32_1 : i32, i32, i32, i32
  }
  func.func @transform_1(%arg0: i32, %arg1: i32) -> (i32, i32) {
    %c0_i32 = arith.constant 0 : i32
    %c0_i32_0 = arith.constant 0 : i32
    %c0_i32_1 = arith.constant 0 : i32
    return %c0_i32, %c0_i32_0 : i32, i32
  }
  func.func @transform_2(%arg0: i32, %arg1: i32) -> (i32, i32) {
    %c0_i32 = arith.constant 0 : i32
    %c0_i32_0 = arith.constant 0 : i32
    %c0_i32_1 = arith.constant 0 : i32
    return %c0_i32, %c0_i32_0 : i32, i32
  }
  func.func @transform_3(%arg0: i32, %arg1: i32) -> (i32, i32) {
    %c0_i32 = arith.constant 0 : i32
    %c0_i32_0 = arith.constant 0 : i32
    %c0_i32_1 = arith.constant 0 : i32
    return %c0_i32, %c0_i32_0 : i32, i32
  }
  func.func @transform_4(%arg0: i32, %arg1: i32) -> (i32, i32) {
    %c0_i32 = arith.constant 0 : i32
    %c0_i32_0 = arith.constant 0 : i32
    %c0_i32_1 = arith.constant 0 : i32
    return %c0_i32, %c0_i32_0 : i32, i32
  }
  func.func @transform_5(%arg0: i32, %arg1: i32) -> (i32, i32, i32, i32) {
    %c0_i32 = arith.constant 0 : i32
    %c0_i32_0 = arith.constant 0 : i32
    %c0_i32_1 = arith.constant 0 : i32
    return %arg0, %arg1, %c0_i32, %c0_i32_0 : i32, i32, i32, i32
  }
}

</mosaic_0001>

<bundles_post_ra>
// kernel: tpu_custom_call.1
= control target key start
LH: loop header
LB: loop body
LE: loop exit
PB: predicated region body
PF: predicated region fallthrough
CT: control target
= control target key end

     0   :  { %s3234_s18 = smov 0   ;;  %s3236_s19 = smov 0   ;;  %s4581_s0 = inlined_call_operand.vmem [shape: f32[2,20,18,4], index: 0, kind: input, shape index: {}]   ;;  %s4582_s1 = inlined_call_operand.vmem [shape: f32[36,8], index: 1, kind: input, shape index: {}]   ;;  %s4583_s2 = inlined_call_operand.vmem [shape: f32[1,8], index: 2, kind: input, shape index: {}]   ;;  %s4584_s3 = inlined_call_operand.vmem [shape: f32[72,8], index: 3, kind: input, shape index: {}]   ;;  %s4585_s4 = inlined_call_operand.vmem [shape: f32[1,8], index: 4, kind: input, shape index: {}]   ;;  %s4586_s5 = inlined_call_operand.vmem [shape: f32[2,16,16,8], index: 5, kind: output, shape index: {}]  }
   0x1   :  { %s3238_s20 = smov 0   ;;  %s3240_s21 = smov 0  }
   0x2   :  { %s3242_s22 = smov 0  }
   0x3 LB: > { %s24_s23 = sadd.s32 1, %s3181_s20  ;;  %s27_s24 = sadd.s32 1, %s3185_s21  ;;  %s3189_s22 = sphi %s3242_s22, %s15_s22   ;;  %s3185_s21 = sphi %s3240_s21, %s4592_s21   ;;  %s3181_s20 = sphi %s3238_s20, %s4591_s20   ;;  %s3177_s19 = sphi %s3236_s19, %s4590_s19   ;;  %s3173_s18 = sphi %s3234_s18, %s4589_s18  }
   0x4   : > { %p25_p0 = scmp.ge.s32.totalorder %s24_s23, 2  ;;  %p2767_p1 = scmp.ge.s32.totalorder %s3189_s22, 1 }
   0x5   : > { %p201_p2 = scmp.lt.s32.totalorder %s3189_s22, 5 }
   0x6   : > { %s4594_s23 = smov (%p25_p0, %s24_s23), 0  ;;  %s4596_s24 = smov (!%p25_p0, %s27_s24), %s3185_s21 }
   0x7   : > { %p202_p3 = pnand %p2767_p1, %p201_p2  ;;  %p29_p4 = scmp.ge.s32.totalorder %s4596_s24, 2 }
   0x8   : > { %p234_p5 = scmp.lt.s32.totalorder (!%p202_p3), %s3177_s19, 1  ;;  %s2774_s25 = smul.u32 (!%p202_p3), 192, %s3173_s18  ;;  %v1247_v11 = vld [vmem:[%s4582_s1] sm:$0xff] (!%p202_p3)  ;;  %v1248_v12 = vld [vmem:[%s4582_s1 + $0x8] sm:$0xff] (!%p202_p3)  ;;  %v1249_v14 = vld [vmem:[%s4582_s1 + $0x10] sm:$0xff] (!%p202_p3)  ;;  %vm1320_vm0 = vcmask (!%p202_p3), 1043456  }
   0x9   : > { %s4598_s24 = smov (%p29_p4, %s4596_s24), 0  ;;  %205 = sbr.rel (%p202_p3) target bundleno = 1039 (0x40f), region = 40 }
   0xa   : > { %s3191_s6 = smov (!%p202_p3), 8   ;;  %s3192_s7 = smov (!%p202_p3), 4   ;;  %v3073_v13 = vpack.c.bf16 (!%p202_p3), %v1248_v12, %v1247_v11  ;;  %v1250_v15 = vld [vmem:[%s4582_s1 + $0x18] sm:$0xff] (!%p202_p3)  ;;  %v1251_v19 = vld [vmem:[%s4582_s1 + $0x20] sm:$0xf] (!%p202_p3)  ;;  %vm1079_vm1 = vcmask (!%p202_p3), 31744  }
   0xb   : > { %s3193_s8 = smov (!%p202_p3), 12   ;;  %s3194_s9 = smov (!%p202_p3), 16   ;;  %v3077_v18 = vpack.c.bf16 (!%p202_p3), %v1250_v15, %v1249_v14  ;;  %vm1100_vm2 = vcmask (!%p202_p3), 64512   ;;  %vm1121_vm3 = vcmask (!%p202_p3), 97280   ;;  %vm1142_vm4 = vcmask (!%p202_p3), 130048  }
   0xc   : > { %s3195_s10 = smov (!%p202_p3), 20   ;;  %s3196_s15 = smov (!%p202_p3), 24   ;;  %3074 = vmatprep.subr.bf16.mxu0 (!%p202_p3), %v3073_v13  ;;  %vm1163_vm5 = vcmask (!%p202_p3), 162816   ;;  %vm1184_vm6 = vcmask (!%p202_p3), 195584   ;;  %vm1205_vm7 = vcmask (!%p202_p3), 228352   ;;  %vm1226_vm8 = vcmask (!%p202_p3), 261120  }
   0xd   : > { %3076 = vmatpush3.bf16.msra.mxu0 (!%p202_p3), %v3073_v13  ;;  %s3197_s27 = smov (!%p202_p3), 28   ;;  %s3198_s11 = smov (!%p202_p3), 32   ;;  %vm1259_vm9 = vcmask (!%p202_p3), 293888   ;;  %vm1590_vm10 = vcmask (!%p202_p3), 57344  }
   0xe   : > { %3078 = vmatprep.subr.bf16.mxu0 (!%p202_p3), %v3077_v18  ;;  %s3201_s28 = smov (!%p202_p3), 56   ;;  %s3202_s12 = smov (!%p202_p3), 48  }
  0x10   : > { %s4600_s19 = smov (!%p234_p5, %s3177_s19), 1 }
  0x11   : > { %s3097_s26 = smul.u32 480, %s4600_s19  ;;  %3080 = vmatpush3.bf16.msra.mxu0 %v3077_v18 }
  0x12   : > { %2999 = vmatprep.subr.msk.mxu0 %vm1320_vm0, %v1251_v19 }
  0x13   : > { %s238_s29 = scalar_lea.vmem %s4581_s0, %s3097_s26 }
  0x14   : > { %s3273_s30 = scalar_lea.vmem %s238_s29, %s2774_s25 }
  0x15   : > { %v293_v0 = vld [vmem:[%s3273_s30 + $0x2] sm:$0xff]  ;;  %v294_v2 = vld [vmem:[%s3273_s30 + $0xa] sm:$0xff]  ;;  %v3287_v5 = vld [vmem:[%s3273_s30 + $0x18] sm:$0xff]  ;;  %3000 = vmatpush3.msk.msra.mxu0 %vm1320_vm0, %v1251_v19 }
  0x16   : > { %v273_v1 = vld [vmem:[%s3273_s30 + $0x1] sm:$0xff]  ;;  %539 = vrot.lane.b32.xlu1 %v293_v0, %s3191_s6  ;;  %v274_v3 = vld [vmem:[%s3273_s30 + $0x9] sm:$0xff]  ;;  %v275_v6 = vld [vmem:[%s3273_s30 + $0x19] sm:$0xff] }
  0x17   : > { %459 = vrot.lane.b32.xlu0 %v273_v1, %s3192_s7  ;;  %v3284_v4 = vld [vmem:[%s3273_s30 + $0x20] sm:$0xff]  ;;  %v3303_v9 = vld [vmem:[%s3273_s30 + $0x30] sm:$0xff]  ;;  %v3326_v17 = vld [vmem:[%s3273_s30 + $0x38] sm:$0xff] }
  0x18   : > { %v2817_v7 = vld [vmem:[%s3273_s30 + $0x1a] sm:$0xff]  ;;  %v2818_v10 = vld [vmem:[%s3273_s30 + $0x22] sm:$0xff]  ;;  %v2859_v16 = vld [vmem:[%s3273_s30 + $0x31] sm:$0xff] }
  0x19   : > { %v2798_v8 = vld [vmem:[%s3273_s30 + $0x21] sm:$0xff]  ;;  %v2879_v20 = vld [vmem:[%s3273_s30 + $0x32] sm:$0xff]  ;;  %v2861_v24 = vld [vmem:[%s3273_s30 + $0x49] sm:$0xff] }
  0x1a   : > { %541 = vrot.lane.b32.xlu1 %v294_v2, %s3191_s6  ;;  %v2860_v21 = vld [vmem:[%s3273_s30 + $0x39] sm:$0xff]  ;;  %v3349_v23 = vld [vmem:[%s3273_s30 + $0x48] sm:$0xff]  ;;  %v3359_v25 = vld [vmem:[%s3273_s30 + $0x50] sm:$0xff] }
  0x1b   : > { %461 = vrot.lane.b32.xlu0 %v274_v3, %s3192_s7  ;;  %v2880_v22 = vld [vmem:[%s3273_s30 + $0x3a] sm:$0xff]  ;;  %v2881_v26 = vld [vmem:[%s3273_s30 + $0x4a] sm:$0xff]  ;;  %v2882_v28 = vld [vmem:[%s3273_s30 + $0x52] sm:$0xff] }
  0x1c   : > { %v2862_v27 = vld [vmem:[%s3273_s30 + $0x51] sm:$0xff]  ;;  %v3379_v29 = vld [vmem:[%s3273_s30 + $0x60] sm:$0xff]  ;;  %v3389_v31 = vld [vmem:[%s3273_s30 + $0x68] sm:$0xff] }
  0x1d   : > { %v2863_v30 = vld [vmem:[%s3273_s30 + $0x61] sm:$0xff]  ;;  %v2864_v33 = vld [vmem:[%s3273_s30 + $0x69] sm:$0xff]  ;;  %v3409_v37 = vld [vmem:[%s3273_s30 + $0x78] sm:$0xff] }
  0x1e   : > { %621 = vrot.lane.b32.xlu1 %v3284_v4, %s3193_s8  ;;  %v2883_v32 = vld [vmem:[%s3273_s30 + $0x62] sm:$0xff]  ;;  %v2884_v34 = vld [vmem:[%s3273_s30 + $0x6a] sm:$0xff]  ;;  %v2865_v42 = vld [vmem:[%s3273_s30 + $0x79] sm:$0xff] }
  0x1f   : > { %619 = vrot.lane.b32.xlu0 %v3287_v5, %s3193_s8  ;;  %v3423_v43 = vld [vmem:[%s3273_s30 + $0x80] sm:$0xff]  ;;  %v3456_v62 = vld [vmem:[%s3273_s30 + $0x90] sm:$0xff]  ;;  %v254_v2 = vld [vmem:[%s3273_s30 + $0x8] sm:$0xff] }
  0x20   : > { %v2885_v48 = vld [vmem:[%s3273_s30 + $0x7a] sm:$0xff]  ;;  %v2886_v54 = vld [vmem:[%s3273_s30 + $0x82] sm:$0xff]  ;;  %v2867_v15 = vld [vmem:[%s3273_s30 + $0x91] sm:$0xff] }
  0x21   : > { %v2866_v49 = vld [vmem:[%s3273_s30 + $0x81] sm:$0xff] }
  0x22   : > { %463 = vrot.lane.b32.xlu1 %v275_v6, %s3192_s7  ;;  %v253_v57 = vld [vmem:[%s3273_s30] sm:$0xff] }
  0x23   : > { %699 = vrot.lane.b32.xlu0 %v275_v6, %s3194_s9 }
  0x26   : > { %779 = vrot.lane.b32.xlu1 %v2817_v7, %s3195_s10 }
  0x27   : > { %701 = vrot.lane.b32.xlu0 %v2798_v8, %s3194_s9 }
  0x2a   : > { %543 = vrot.lane.b32.xlu1 %v2817_v7, %s3191_s6 }
  0x2b   : > { %465 = vrot.lane.b32.xlu0 %v2798_v8, %s3192_s7 }
  0x2e   : > { %859 = vrot.lane.b32.xlu1 %v3303_v9, %s3196_s15 }
  0x2f   : > { %781 = vrot.lane.b32.xlu0 %v2818_v10, %s3195_s10 }
  0x32   : > { %623 = vrot.lane.b32.xlu1 %v3303_v9, %s3193_s8 }
  0x33   : > { %545 = vrot.lane.b32.xlu0 %v2818_v10, %s3191_s6 }
  0x36   : > { %939 = vrot.lane.b32.xlu1 %v2859_v16, %s3197_s27 }
  0x37   : > { %861 = vrot.lane.b32.xlu0 %v3326_v17, %s3196_s15 }
  0x3a   : > { %703 = vrot.lane.b32.xlu1 %v2859_v16, %s3194_s9 }
  0x3b   : > { %625 = vrot.lane.b32.xlu0 %v3326_v17, %s3193_s8 }
  0x3e   : > { %1019 = vrot.lane.b32.xlu1 %v2879_v20, %s3198_s11 }
  0x3f   : > { %941 = vrot.lane.b32.xlu0 %v2860_v21, %s3197_s27 }
  0x42   : > { %705 = vrot.lane.b32.xlu1 %v2860_v21, %s3194_s9 }
  0x43   : > { %467 = vrot.lane.b32.xlu0 %v2859_v16, %s3192_s7  ;;  %v3481_v16 = vld [vmem:[%s3273_s30 + $0x98] sm:$0xff] }
  0x46   : > { %1021 = vrot.lane.b32.xlu1 %v2880_v22, %s3198_s11 }
  0x47   : > { %783 = vrot.lane.b32.xlu0 %v2879_v20, %s3195_s10 }
  0x4a   : > { %547 = vrot.lane.b32.xlu1 %v2879_v20, %s3191_s6 }
  0x4b   : > { %469 = vrot.lane.b32.xlu0 %v2860_v21, %s3192_s7 }
  0x4e   : > { %863 = vrot.lane.b32.xlu1 %v3349_v23, %s3196_s15 }
  0x4f   : > { %785 = vrot.lane.b32.xlu0 %v2880_v22, %s3195_s10 }
  0x52   : > { %627 = vrot.lane.b32.xlu1 %v3349_v23, %s3193_s8 }
  0x53   : > { %549 = vrot.lane.b32.xlu0 %v2880_v22, %s3191_s6 }
  0x56   : > { %943 = vrot.lane.b32.xlu1 %v2861_v24, %s3197_s27 }
  0x57   : > { %865 = vrot.lane.b32.xlu0 %v3359_v25, %s3196_s15 }
  0x5a   : > { %707 = vrot.lane.b32.xlu1 %v2861_v24, %s3194_s9 }
  0x5b   : > { %629 = vrot.lane.b32.xlu0 %v3359_v25, %s3193_s8 }
  0x5e   : > { %1023 = vrot.lane.b32.xlu1 %v2881_v26, %s3198_s11 }
  0x5f   : > { %945 = vrot.lane.b32.xlu0 %v2862_v27, %s3197_s27 }
  0x62   : > { %709 = vrot.lane.b32.xlu1 %v2862_v27, %s3194_s9 }
  0x63   : > { %471 = vrot.lane.b32.xlu0 %v2861_v24, %s3192_s7 }
  0x66   : > { %1025 = vrot.lane.b32.xlu1 %v2882_v28, %s3198_s11 }
  0x67   : > { %787 = vrot.lane.b32.xlu0 %v2881_v26, %s3195_s10 }
  0x6a   : > { %551 = vrot.lane.b32.xlu1 %v2881_v26, %s3191_s6 }
  0x6b   : > { %473 = vrot.lane.b32.xlu0 %v2862_v27, %s3192_s7 }
  0x6e   : > { %867 = vrot.lane.b32.xlu1 %v3379_v29, %s3196_s15 }
  0x6f   : > { %789 = vrot.lane.b32.xlu0 %v2882_v28, %s3195_s10 }
  0x72   : > { %631 = vrot.lane.b32.xlu1 %v3379_v29, %s3193_s8 }
  0x73   : > { %553 = vrot.lane.b32.xlu0 %v2882_v28, %s3191_s6 }
  0x76   : > { %947 = vrot.lane.b32.xlu1 %v2863_v30, %s3197_s27 }
  0x77   : > { %869 = vrot.lane.b32.xlu0 %v3389_v31, %s3196_s15 }
  0x7a   : > { %711 = vrot.lane.b32.xlu1 %v2863_v30, %s3194_s9 }
  0x7b   : > { %633 = vrot.lane.b32.xlu0 %v3389_v31, %s3193_s8 }
  0x7e   : > { %1027 = vrot.lane.b32.xlu1 %v2883_v32, %s3198_s11 }
  0x7f   : > { %949 = vrot.lane.b32.xlu0 %v2864_v33, %s3197_s27 }
  0x82   : > { %713 = vrot.lane.b32.xlu1 %v2864_v33, %s3194_s9 }
  0x83   : > { %475 = vrot.lane.b32.xlu0 %v2863_v30, %s3192_s7 }
  0x86   : > { %1029 = vrot.lane.b32.xlu1 %v2884_v34, %s3198_s11 }
  0x87   : > { %791 = vrot.lane.b32.xlu0 %v2883_v32, %s3195_s10 }
  0x88   : > { %v540_v35 = vpop.permute.xlu1 %539 }
  0x89   : > { %v460_v36 = vpop.permute.xlu0 %459 }
  0x8a   : > { %555 = vrot.lane.b32.xlu1 %v2883_v32, %s3191_s6  ;;  %v1080_v58 = vsel %vm1079_vm1, %v253_v57, %v460_v36  ;;  %v2887_v32 = vld [vmem:[%s3273_s30 + $0x92] sm:$0xff] }
  0x8b   : > { %477 = vrot.lane.b32.xlu0 %v2864_v33, %s3192_s7  ;;  %v1101_v61 = vsel %vm1100_vm2, %v1080_v58, %v540_v35  ;;  %v2868_v33 = vld [vmem:[%s3273_s30 + $0x99] sm:$0xff] }
  0x8c   : > { %v3411_v38 = vpop.permute.xlu1 %541 }
  0x8d   : > { %v462_v39 = vpop.permute.xlu0 %461 }
  0x8e   : > { %871 = vrot.lane.b32.xlu1 %v3409_v37, %s3196_s15  ;;  %v1081_v8 = vsel %vm1079_vm1, %v254_v2, %v462_v39  ;;  %v2888_v39 = vld [vmem:[%s3273_s30 + $0x9a] sm:$0xff] }
  0x8f   : > { %793 = vrot.lane.b32.xlu0 %v2884_v34, %s3195_s10  ;;  %v1102_v14 = vsel %vm1100_vm2, %v1081_v8, %v3411_v38 }
  0x90   : > { %v3416_v40 = vpop.permute.xlu1 %621 }
  0x91   : > { %v620_v41 = vpop.permute.xlu0 %619  ;;  %v1123_v18 = vsel %vm1121_vm3, %v1102_v14, %v3416_v40 }
  0x92   : > { %635 = vrot.lane.b32.xlu1 %v3409_v37, %s3193_s8  ;;  %v1122_v63 = vsel %vm1121_vm3, %v1101_v61, %v620_v41  ;;  %v2869_v61 = vld [vmem:[%s3273_s30 + $0xa9] sm:$0xff] }
  0x93   : > { %557 = vrot.lane.b32.xlu0 %v2884_v34, %s3191_s6 }
  0x94   : > { %v3425_v44 = vpop.permute.xlu1 %463 }
  0x95   : > { %v700_v45 = vpop.permute.xlu0 %699 }
  0x96   : > { %951 = vrot.lane.b32.xlu1 %v2865_v42, %s3197_s27  ;;  %v1143_v3 = vsel %vm1142_vm4, %v1122_v63, %v700_v45  ;;  %v3550_v63 = vld [vmem:[%s3273_s30 + $0xb0] sm:$0xff] }
  0x97   : > { %873 = vrot.lane.b32.xlu0 %v3423_v43, %s3196_s15 }
  0x98   : > { %v780_v46 = vpop.permute.xlu1 %779 }
  0x99   : > { %v702_v47 = vpop.permute.xlu0 %701  ;;  %v1164_v6 = vsel %vm1163_vm5, %v1143_v3, %v780_v46  ;;  %v1082_v46 = vsel %vm1079_vm1, %v3287_v5, %v3425_v44 }
  0x9a   : > { %715 = vrot.lane.b32.xlu1 %v2865_v42, %s3194_s9  ;;  %v1144_v21 = vsel %vm1142_vm4, %v1123_v18, %v702_v47  ;;  %v2890_v18 = vld [vmem:[%s3273_s30 + $0xb2] sm:$0xff] }
  0x9b   : > { %637 = vrot.lane.b32.xlu0 %v3423_v43, %s3193_s8 }
  0x9c   : > { %v3435_v50 = vpop.permute.xlu1 %543 }
  0x9d   : > { %v3437_v51 = vpop.permute.xlu0 %465  ;;  %v1103_v47 = vsel %vm1100_vm2, %v1082_v46, %v3435_v50  ;;  %v2871_v46 = vld [vmem:[%s3273_s30 + $0xc1] sm:$0xff] }
  0x9e   : > { %1031 = vrot.lane.b32.xlu1 %v2885_v48, %s3198_s11 }
  0x9f   : > { %953 = vrot.lane.b32.xlu0 %v2866_v49, %s3197_s27 }
  0xa0   : > { %v860_v52 = vpop.permute.xlu1 %859 }
  0xa1   : > { %v782_v53 = vpop.permute.xlu0 %781  ;;  %v1185_v7 = vsel %vm1184_vm6, %v1164_v6, %v860_v52 }
  0xa2   : > { %717 = vrot.lane.b32.xlu1 %v2866_v49, %s3194_s9  ;;  %v1165_v22 = vsel %vm1163_vm5, %v1144_v21, %v782_v53 }
  0xa3   : > { %479 = vrot.lane.b32.xlu0 %v2865_v42, %s3192_s7 }
  0xa4   : > { %v3444_v55 = vpop.permute.xlu1 %623 }
  0xa5   : > { %v3446_v56 = vpop.permute.xlu0 %545 }
  0xa6   : > { %1033 = vrot.lane.b32.xlu1 %v2886_v54, %s3198_s11 }
  0xa7   : > { %795 = vrot.lane.b32.xlu0 %v2885_v48, %s3195_s10 }
  0xa8   : > { %v940_v59 = vpop.permute.xlu1 %939 }
  0xa9   : > { %v862_v60 = vpop.permute.xlu0 %861  ;;  %v1206_v10 = vsel %vm1205_vm7, %v1185_v7, %v940_v59  ;;  %v1083_v59 = vsel %vm1079_vm1, %v3284_v4, %v3437_v51 }
  0xaa   : > { %559 = vrot.lane.b32.xlu1 %v2885_v48, %s3191_s6  ;;  %v1186_v24 = vsel %vm1184_vm6, %v1165_v22, %v862_v60  ;;  %v3524_v48 = vld [vmem:[%s3273_s30 + $0xa8] sm:$0xff]  ;;  %v1104_v60 = vsel %vm1100_vm2, %v1083_v59, %v3446_v56 }
  0xab   : > { %481 = vrot.lane.b32.xlu0 %v2866_v49, %s3192_s7  ;;  %v1124_v49 = vsel %vm1121_vm3, %v1103_v47, %v3444_v55  ;;  %v3618_v47 = vld [vmem:[%s3273_s30 + $0xc8] sm:$0xff] }
  0xac   : > { %v3459_v0 = vpop.permute.xlu1 %703 }
  0xad   : > { %v3461_v1 = vpop.permute.xlu0 %625  ;;  %v1145_v5 = vsel %vm1142_vm4, %v1124_v49, %v3459_v0 }
  0xae   : > { %875 = vrot.lane.b32.xlu1 %v3456_v62, %s3196_s15  ;;  %v1125_v0 = vsel %vm1121_vm3, %v1104_v60, %v3461_v1 }
  0xaf   : > { %797 = vrot.lane.b32.xlu0 %v2886_v54, %s3195_s10 }
  0xb0   : > { %v1020_v11 = vpop.permute.xlu1 %1019 }
  0xb1   : > { %v942_v12 = vpop.permute.xlu0 %941  ;;  %v1227_v13 = vsel %vm1226_vm8, %v1206_v10, %v1020_v11  ;;  %v2889_v10 = vld [vmem:[%s3273_s30 + $0xaa] sm:$0xff] }
  0xb2   : > { %639 = vrot.lane.b32.xlu1 %v3456_v62, %s3193_s8  ;;  %3001 = vmatprep.mubr.msk.f32.mxu0 %vm1259_vm9, %v1227_v13  ;;  %v1207_v26 = vsel %vm1205_vm7, %v1186_v24, %v942_v12  ;;  %v2870_v11 = vld [vmem:[%s3273_s30 + $0xb1] sm:$0xff] }
  0xb3   : > { %561 = vrot.lane.b32.xlu0 %v2886_v54, %s3191_s6 }
  0xb4   : > { %v706_v19 = vpop.permute.xlu1 %705 }
  0xb5   : > { %v3485_v20 = vpop.permute.xlu0 %467  ;;  %v1146_v51 = vsel %vm1142_vm4, %v1125_v0, %v706_v19  ;;  %v2892_v0 = vld [vmem:[%s3273_s30 + $0xca] sm:$0xff] }
  0xb6   : > { %955 = vrot.lane.b32.xlu1 %v2867_v15, %s3197_s27 }
  0xb7   : > { %877 = vrot.lane.b32.xlu0 %v3481_v16, %s3196_s15 }
  0xb8   : > { %v1022_v27 = vpop.permute.xlu1 %1021 }
  0xb9   : > { %v784_v28 = vpop.permute.xlu0 %783  ;;  %v1228_v30 = vsel %vm1226_vm8, %v1207_v26, %v1022_v27  ;;  %v1084_v26 = vsel %vm1079_vm1, %v3303_v9, %v3485_v20 }
  0xba   : > { %719 = vrot.lane.b32.xlu1 %v2867_v15, %s3194_s9  ;;  %3002 = vmatmul.mubr.msk.f32.vlgmr.msra.gmra.mrb[0].mxu0 %vm1259_vm9, %v1228_v30  ;;  %v1166_v44 = vsel %vm1163_vm5, %v1145_v5, %v784_v28  ;;  %v3593_v28 = vld [vmem:[%s3273_s30 + $0xc0] sm:$0xff] }
  0xbb   : > { %641 = vrot.lane.b32.xlu0 %v3481_v16, %s3193_s8 }
  0xbc   : > { %v3501_v34 = vpop.permute.xlu1 %547 }
  0xbd   : > { %v3503_v35 = vpop.permute.xlu0 %469  ;;  %v1105_v27 = vsel %vm1100_vm2, %v1084_v26, %v3501_v34  ;;  %v2873_v26 = vld [vmem:[%s3273_s30 + $0xd9] sm:$0xff] }
  0xbe   : > { %1035 = vrot.lane.b32.xlu1 %v2887_v32, %s3198_s11 }
  0xbf   : > { %957 = vrot.lane.b32.xlu0 %v2868_v33, %s3197_s27 }
  0xc0   : > { %v864_v36 = vpop.permute.xlu1 %863 }
  0xc1   : > { %v786_v38 = vpop.permute.xlu0 %785  ;;  %v1187_v50 = vsel %vm1184_vm6, %v1166_v44, %v864_v36 }
  0xc2   : > { %721 = vrot.lane.b32.xlu1 %v2868_v33, %s3194_s9  ;;  %v1167_v3 = vsel %vm1163_vm5, %v1146_v51, %v786_v38 }
  0xc3   : > { %483 = vrot.lane.b32.xlu0 %v2867_v15, %s3192_s7 }
  0xc4   : > { %v3510_v40 = vpop.permute.xlu1 %627 }
  0xc5   : > { %v3512_v41 = vpop.permute.xlu0 %549  ;;  %v1126_v30 = vsel %vm1121_vm3, %v1105_v27, %v3510_v40  ;;  %v3690_v27 = vld [vmem:[%s3273_s30 + $0xe0] sm:$0xff] }
  0xc6   : > { %1037 = vrot.lane.b32.xlu1 %v2888_v39, %s3198_s11 }
  0xc7   : > { %799 = vrot.lane.b32.xlu0 %v2887_v32, %s3195_s10 }
  0xc8   : > { %v944_v42 = vpop.permute.xlu1 %943 }
  0xc9   : > { %v866_v45 = vpop.permute.xlu0 %865  ;;  %v1208_v54 = vsel %vm1205_vm7, %v1187_v50, %v944_v42  ;;  %v1085_v42 = vsel %vm1079_vm1, %v3326_v17, %v3503_v35 }
  0xca   : > { %563 = vrot.lane.b32.xlu1 %v2887_v32, %s3191_s6  ;;  %v1188_v56 = vsel %vm1184_vm6, %v1167_v3, %v866_v45  ;;  %v1106_v45 = vsel %vm1100_vm2, %v1085_v42, %v3512_v41 }
  0xcb   : > { %485 = vrot.lane.b32.xlu0 %v2868_v33, %s3192_s7 }
  0xcc   : > { %v708_v52 = vpop.permute.xlu1 %707 }
  0xcd   : > { %v3528_v53 = vpop.permute.xlu0 %629  ;;  %v1147_v36 = vsel %vm1142_vm4, %v1126_v30, %v708_v52 }
  0xce   : > { %879 = vrot.lane.b32.xlu1 %v3524_v48, %s3196_s15  ;;  %v1127_v49 = vsel %vm1121_vm3, %v1106_v45, %v3528_v53 }
  0xcf   : > { %801 = vrot.lane.b32.xlu0 %v2888_v39, %s3195_s10 }
  0xd0   : > { %v1024_v55 = vpop.permute.xlu1 %1023 }
  0xd1   : > { %v946_v57 = vpop.permute.xlu0 %945  ;;  %v1229_v58 = vsel %vm1226_vm8, %v1208_v54, %v1024_v55  ;;  %v2891_v55 = vld [vmem:[%s3273_s30 + $0xc2] sm:$0xff] }
  0xd2   : > { %643 = vrot.lane.b32.xlu1 %v3524_v48, %s3193_s8  ;;  %3004 = vmatprep.mubr.msk.f32.mxu0 %vm1259_vm9, %v1229_v58  ;;  %v1209_v6 = vsel %vm1205_vm7, %v1188_v56, %v946_v57  ;;  %v2872_v57 = vld [vmem:[%s3273_s30 + $0xc9] sm:$0xff] }
  0xd3   : > { %565 = vrot.lane.b32.xlu0 %v2888_v39, %s3191_s6 }
  0xd4   : > { %v710_v2 = vpop.permute.xlu1 %709 }
  0xd5   : > { %v3554_v4 = vpop.permute.xlu0 %471  ;;  %v1148_v35 = vsel %vm1142_vm4, %v1127_v49, %v710_v2 }
  0xd6   : > { %959 = vrot.lane.b32.xlu1 %v2869_v61, %s3197_s27 }
  0xd7   : > { %881 = vrot.lane.b32.xlu0 %v3550_v63, %s3196_s15 }
  0xd8   : > { %v1026_v7 = vpop.permute.xlu1 %1025 }
  0xd9   : > { %v788_v1 = vpop.permute.xlu0 %787  ;;  %v1230_v8 = vsel %vm1226_vm8, %v1209_v6, %v1026_v7  ;;  %v1086_v6 = vsel %vm1079_vm1, %v3349_v23, %v3554_v4 }
  0xda   : > { %723 = vrot.lane.b32.xlu1 %v2869_v61, %s3194_s9  ;;  %3005 = vmatmul.mubr.msk.f32.gmra.mrb[2].mxu0 %vm1259_vm9, %v1230_v8  ;;  %v1168_v9 = vsel %vm1163_vm5, %v1147_v36, %v788_v1  ;;  %v3663_v1 = vld [vmem:[%s3273_s30 + $0xd8] sm:$0xff] }
  0xdb   : > { %645 = vrot.lane.b32.xlu0 %v3550_v63, %s3193_s8 }
  0xdc   : > { %v3570_v12 = vpop.permute.xlu1 %551 }
  0xdd   : > { %v3572_v13 = vpop.permute.xlu0 %473  ;;  %v1107_v7 = vsel %vm1100_vm2, %v1086_v6, %v3570_v12 }
  0xde   : > { %1039 = vrot.lane.b32.xlu1 %v2889_v10, %s3198_s11 }
  0xdf   : > { %961 = vrot.lane.b32.xlu0 %v2870_v11, %s3197_s27 }
  0xe0   : > { %v868_v14 = vpop.permute.xlu1 %867 }
  0xe1   : > { %v790_v15 = vpop.permute.xlu0 %789  ;;  %v1189_v20 = vsel %vm1184_vm6, %v1168_v9, %v868_v14 }
  0xe2   : > { %725 = vrot.lane.b32.xlu1 %v2870_v11, %s3194_s9  ;;  %v1169_v5 = vsel %vm1163_vm5, %v1148_v35, %v790_v15 }
  0xe3   : > { %487 = vrot.lane.b32.xlu0 %v2869_v61, %s3192_s7 }
  0xe4   : > { %v3579_v19 = vpop.permute.xlu1 %631 }
  0xe5   : > { %v3581_v21 = vpop.permute.xlu0 %553  ;;  %v1128_v8 = vsel %vm1121_vm3, %v1107_v7, %v3579_v19  ;;  %v2875_v7 = vld [vmem:[%s3273_s30 + $0xf1] sm:$0xff] }
  0xe6   : > { %1041 = vrot.lane.b32.xlu1 %v2890_v18, %s3198_s11 }
  0xe7   : > { %803 = vrot.lane.b32.xlu0 %v2889_v10, %s3195_s10 }
  0xe8   : > { %v948_v22 = vpop.permute.xlu1 %947 }
  0xe9   : > { %v870_v24 = vpop.permute.xlu0 %869  ;;  %v1210_v34 = vsel %vm1205_vm7, %v1189_v20, %v948_v22  ;;  %v1087_v22 = vsel %vm1079_vm1, %v3359_v25, %v3572_v13  ;;  %v3199_v13 = vmov 0.0  }
  0xea   : > { %567 = vrot.lane.b32.xlu1 %v2889_v10, %s3191_s6  ;;  %v1190_v41 = vsel %vm1184_vm6, %v1169_v5, %v870_v24  ;;  %v1108_v24 = vsel %vm1100_vm2, %v1087_v22, %v3581_v21  ;;  %1601 = vst.msk [vmem:[#allocation2 + $0x11] sm:$0x1] %vm1590_vm10, %v3199_v13  ;;  %1591 = vst.msk [vmem:[#allocation2] sm:$0x1] %vm1590_vm10, %v3199_v13 }
  0xeb   : > { %489 = vrot.lane.b32.xlu0 %v2870_v11, %s3192_s7  ;;  %1592 = vst.msk [vmem:[#allocation2 + $0x18] sm:$0x1] %vm1590_vm10, %v3199_v13  ;;  %1593 = vst.msk [vmem:[#allocation2 + $0x30] sm:$0x1] %vm1590_vm10, %v3199_v13 }
  0xec   : > { %v712_v32 = vpop.permute.xlu1 %711  ;;  %1594 = vst.msk [vmem:[#allocation2 + $0x48] sm:$0x1] %vm1590_vm10, %v3199_v13  ;;  %1595 = vst.msk [vmem:[#allocation2 + $0x60] sm:$0x1] %vm1590_vm10, %v3199_v13 }
  0xed   : > { %v3597_v33 = vpop.permute.xlu0 %633  ;;  %v1149_v23 = vsel %vm1142_vm4, %v1128_v8, %v712_v32  ;;  %1596 = vst.msk [vmem:[#allocation2 + $0x78] sm:$0x1] %vm1590_vm10, %v3199_v13  ;;  %1597 = vst.msk [vmem:[#allocation2 + $0x90] sm:$0x1] %vm1590_vm10, %v3199_v13  ;;  %v2856_v8 = vld [vmem:[%s3273_s30 + $0xf8] sm:$0xff] }
  0xee   : > { %883 = vrot.lane.b32.xlu1 %v3593_v28, %s3196_s15  ;;  %v1129_v30 = vsel %vm1121_vm3, %v1108_v24, %v3597_v33  ;;  %1598 = vst.msk [vmem:[#allocation2 + $0xa8] sm:$0x1] %vm1590_vm10, %v3199_v13  ;;  %1599 = vst.msk [vmem:[#allocation2 + $0xc0] sm:$0x1] %vm1590_vm10, %v3199_v13 }
  0xef   : > { %805 = vrot.lane.b32.xlu0 %v2890_v18, %s3195_s10  ;;  %1600 = vst.msk [vmem:[#allocation2 + $0xd8] sm:$0x1] %vm1590_vm10, %v3199_v13  ;;  %1602 = vst.msk [vmem:[#allocation2 + $0x29] sm:$0x1] %vm1590_vm10, %v3199_v13 }
  0xf0   : > { %v1028_v38 = vpop.permute.xlu1 %1027  ;;  %1603 = vst.msk [vmem:[#allocation2 + $0x41] sm:$0x1] %vm1590_vm10, %v3199_v13  ;;  %1604 = vst.msk [vmem:[#allocation2 + $0x59] sm:$0x1] %vm1590_vm10, %v3199_v13 }
  0xf1   : > { %v950_v39 = vpop.permute.xlu0 %949  ;;  %v1231_v40 = vsel %vm1226_vm8, %v1210_v34, %v1028_v38  ;;  %1605 = vst.msk [vmem:[#allocation2 + $0x71] sm:$0x1] %vm1590_vm10, %v3199_v13  ;;  %1606 = vst.msk [vmem:[#allocation2 + $0x89] sm:$0x1] %vm1590_vm10, %v3199_v13 }
  0xf2   : > { %647 = vrot.lane.b32.xlu1 %v3593_v28, %s3193_s8  ;;  %3007 = vmatprep.mubr.msk.f32.mxu0 %vm1259_vm9, %v1231_v40  ;;  %v1211_v44 = vsel %vm1205_vm7, %v1190_v41, %v950_v39  ;;  %1607 = vst.msk [vmem:[#allocation2 + $0xa1] sm:$0x1] %vm1590_vm10, %v3199_v13  ;;  %1608 = vst.msk [vmem:[#allocation2 + $0xb9] sm:$0x1] %vm1590_vm10, %v3199_v13  ;;  %v2893_v39 = vld [vmem:[%s3273_s30 + $0xda] sm:$0xff] }
  0xf3   : > { %569 = vrot.lane.b32.xlu0 %v2890_v18, %s3191_s6  ;;  %1609 = vst.msk [vmem:[#allocation2 + $0xd1] sm:$0x1] %vm1590_vm10, %v3199_v13  ;;  %1610 = vst.msk [vmem:[#allocation2 + $0xe9] sm:$0x1] %vm1590_vm10, %v3199_v13  ;;  %v2874_v40 = vld [vmem:[%s3273_s30 + $0xe1] sm:$0xff] }
  0xf4   : > { %v3622_v52 = vpop.permute.xlu1 %713 }
  0xf5   : > { %v3624_v17 = vpop.permute.xlu0 %475  ;;  %v1150_v21 = vsel %vm1142_vm4, %v1129_v30, %v3622_v52  ;;  %v2894_v52 = vld [vmem:[%s3273_s30 + $0xe2] sm:$0xff] }
  0xf6   : > { %963 = vrot.lane.b32.xlu1 %v2871_v46, %s3197_s27 }
  0xf7   : > { %885 = vrot.lane.b32.xlu0 %v3618_v47, %s3196_s15 }
  0xf8   : > { %v1030_v50 = vpop.permute.xlu1 %1029 }
  0xf9   : > { %v792_v53 = vpop.permute.xlu0 %791  ;;  %v1232_v54 = vsel %vm1226_vm8, %v1211_v44, %v1030_v50  ;;  %v1088_v50 = vsel %vm1079_vm1, %v3379_v29, %v3624_v17 }
  0xfa   : > { %727 = vrot.lane.b32.xlu1 %v2871_v46, %s3194_s9  ;;  %3008 = vmatmul.mubr.msk.f32.gmra.mrb[4].mxu0 %vm1259_vm9, %v1232_v54  ;;  %v1170_v4 = vsel %vm1163_vm5, %v1149_v23, %v792_v53  ;;  %v2855_v54 = vld [vmem:[%s3273_s30 + $0xf0] sm:$0xff] }
  0xfb   : > { %649 = vrot.lane.b32.xlu0 %v3618_v47, %s3193_s8 }
  0xfc   : > { %v3640_v58 = vpop.permute.xlu1 %555 }
  0xfd   : > { %v3642_v59 = vpop.permute.xlu0 %477  ;;  %v1109_v53 = vsel %vm1100_vm2, %v1088_v50, %v3640_v58  ;;  %v2897_v50 = vld [vmem:[%s3273_s30 + $0x10a] sm:$0xff] }
  0xfe   : > { %1043 = vrot.lane.b32.xlu1 %v2891_v55, %s3198_s11 }
  0xff   : > { %965 = vrot.lane.b32.xlu0 %v2872_v57, %s3197_s27 }
 0x100   : > { %v872_v60 = vpop.permute.xlu1 %871 }
 0x101   : > { %v794_v61 = vpop.permute.xlu0 %793  ;;  %v1191_v12 = vsel %vm1184_vm6, %v1170_v4, %v872_v60 }
 0x102   : > { %729 = vrot.lane.b32.xlu1 %v2872_v57, %s3194_s9  ;;  %v1171_v33 = vsel %vm1163_vm5, %v1150_v21, %v794_v61 }
 0x103   : > { %491 = vrot.lane.b32.xlu0 %v2871_v46, %s3192_s7 }
 0x104   : > { %v3649_v2 = vpop.permute.xlu1 %635 }
 0x105   : > { %v3651_v51 = vpop.permute.xlu0 %557 }
 0x106   : > { %1045 = vrot.lane.b32.xlu1 %v2892_v0, %s3198_s11 }
 0x107   : > { %807 = vrot.lane.b32.xlu0 %v2891_v55, %s3195_s10 }
 0x108   : > { %v952_v3 = vpop.permute.xlu1 %951 }
 0x109   : > { %v874_v56 = vpop.permute.xlu0 %873  ;;  %v1212_v14 = vsel %vm1205_vm7, %v1191_v12, %v952_v3 }
 0x10a   : > { %571 = vrot.lane.b32.xlu1 %v2891_v55, %s3191_s6  ;;  %v1192_v36 = vsel %vm1184_vm6, %v1171_v33, %v874_v56  ;;  %v1130_v55 = vsel %vm1121_vm3, %v1109_v53, %v3649_v2  ;;  %v1089_v56 = vsel %vm1079_vm1, %v3389_v31, %v3642_v59  ;;  %v2858_v33 = vld [vmem:[%s3273_s30 + $0x110] sm:$0xff] }
 0x10b   : > { %493 = vrot.lane.b32.xlu0 %v2872_v57, %s3192_s7  ;;  %v1110_v6 = vsel %vm1100_vm2, %v1089_v56, %v3651_v51 }
 0x10c   : > { %v3667_v10 = vpop.permute.xlu1 %715 }
 0x10d   : > { %v3669_v11 = vpop.permute.xlu0 %637  ;;  %v1151_v61 = vsel %vm1142_vm4, %v1130_v55, %v3667_v10 }
 0x10e   : > { %887 = vrot.lane.b32.xlu1 %v3663_v1, %s3196_s15  ;;  %v1131_v10 = vsel %vm1121_vm3, %v1110_v6, %v3669_v11 }
 0x10f   : > { %809 = vrot.lane.b32.xlu0 %v2892_v0, %s3195_s10 }
 0x110   : > { %v1032_v15 = vpop.permute.xlu1 %1031 }
 0x111   : > { %v954_v18 = vpop.permute.xlu0 %953  ;;  %v1233_v19 = vsel %vm1226_vm8, %v1212_v14, %v1032_v15 }
 0x112   : > { %651 = vrot.lane.b32.xlu1 %v3663_v1, %s3193_s8  ;;  %3010 = vmatprep.mubr.msk.f32.mxu0 %vm1259_vm9, %v1233_v19  ;;  %v1213_v9 = vsel %vm1205_vm7, %v1192_v36, %v954_v18  ;;  %v2895_v18 = vld [vmem:[%s3273_s30 + $0xf2] sm:$0xff]  ;;  %v2857_v36 = vld [vmem:[%s3273_s30 + $0x108] sm:$0xff] }
 0x113   : > { %573 = vrot.lane.b32.xlu0 %v2892_v0, %s3191_s6  ;;  %v2876_v19 = vld [vmem:[%s3273_s30 + $0xf9] sm:$0xff] }
 0x114   : > { %v3694_v32 = vpop.permute.xlu1 %717 }
 0x115   : > { %v3696_v25 = vpop.permute.xlu0 %479  ;;  %v1152_v31 = vsel %vm1142_vm4, %v1131_v10, %v3694_v32  ;;  %v2836_v32 = vld [vmem:[%s3273_s30 + $0xfa] sm:$0xff] }
 0x116   : > { %967 = vrot.lane.b32.xlu1 %v2873_v26, %s3197_s27 }
 0x117   : > { %889 = vrot.lane.b32.xlu0 %v3690_v27, %s3196_s15 }
 0x118   : > { %v1034_v20 = vpop.permute.xlu1 %1033 }
 0x119   : > { %v796_v34 = vpop.permute.xlu0 %795  ;;  %v1234_v38 = vsel %vm1226_vm8, %v1213_v9, %v1034_v20 }
 0x11a   : > { %731 = vrot.lane.b32.xlu1 %v2873_v26, %s3194_s9  ;;  %3011 = vmatmul.mubr.msk.f32.gmra.mrb[6].mxu0 %vm1259_vm9, %v1234_v38  ;;  %v1172_v29 = vsel %vm1163_vm5, %v1151_v61, %v796_v34  ;;  %v1090_v34 = vsel %vm1079_vm1, %v3409_v37, %v3696_v25  ;;  %v2898_v25 = vld [vmem:[%s3273_s30 + $0x112] sm:$0xff] }
 0x11b   : > { %653 = vrot.lane.b32.xlu0 %v3690_v27, %s3193_s8 }
 0x11c   : > { %v3733_v42 = vpop.permute.xlu1 %559 }
 0x11d   : > { %v3735_v45 = vpop.permute.xlu0 %481  ;;  %v1111_v38 = vsel %vm1100_vm2, %v1090_v34, %v3733_v42 }
 0x11e   : > { %1047 = vrot.lane.b32.xlu1 %v2893_v39, %s3198_s11  ;;  %v1091_v55 = vsel %vm1079_vm1, %v3423_v43, %v3735_v45 }
 0x11f   : > { %969 = vrot.lane.b32.xlu0 %v2874_v40, %s3197_s27 }
 0x120   : > { %v876_v46 = vpop.permute.xlu1 %875 }
 0x121   : > { %v798_v49 = vpop.permute.xlu0 %797  ;;  %v1193_v17 = vsel %vm1184_vm6, %v1172_v29, %v876_v46 }
 0x122   : > { %733 = vrot.lane.b32.xlu1 %v2874_v40, %s3194_s9  ;;  %v1173_v59 = vsel %vm1163_vm5, %v1152_v31, %v798_v49 }
 0x123   : > { %495 = vrot.lane.b32.xlu0 %v2873_v26, %s3192_s7 }
 0x124   : > { %v3742_v35 = vpop.permute.xlu1 %639 }
 0x125   : > { %v3744_v5 = vpop.permute.xlu0 %561  ;;  %v1132_v46 = vsel %vm1121_vm3, %v1111_v38, %v3742_v35 }
 0x126   : > { %1049 = vrot.lane.b32.xlu1 %v2894_v52, %s3198_s11 }
 0x127   : > { %811 = vrot.lane.b32.xlu0 %v2893_v39, %s3195_s10 }
 0x128   : > { %v956_v41 = vpop.permute.xlu1 %955 }
 0x129   : > { %v878_v44 = vpop.permute.xlu0 %877  ;;  %v1214_v58 = vsel %vm1205_vm7, %v1193_v17, %v956_v41 }
 0x12a   : > { %575 = vrot.lane.b32.xlu1 %v2893_v39, %s3191_s6  ;;  %v1194_v51 = vsel %vm1184_vm6, %v1173_v59, %v878_v44  ;;  %v2878_v39 = vld [vmem:[%s3273_s30 + $0x111] sm:$0xff] }
 0x12b   : > { %497 = vrot.lane.b32.xlu0 %v2874_v40, %s3192_s7  ;;  %v2877_v40 = vld [vmem:[%s3273_s30 + $0x109] sm:$0xff]  ;;  %s3885_s30 = sshll.u32 %s3173_s18, 3  ;;  %s3200_s18 = smov 40  }
 0x12c   : > { %v720_v57 = vpop.permute.xlu1 %719  ;;  %s2921_s7 = sadd.s32 4294967295, %s3885_s30  ;;  %p242_p6 = scmp.lt.s32.totalorder %s3885_s30, 15 }
 0x12d   : > { %v3758_v60 = vpop.permute.xlu0 %641  ;;  %v1153_v41 = vsel %vm1142_vm4, %v1132_v46, %v720_v57  ;;  %v1112_v57 = vsel %vm1100_vm2, %v1091_v55, %v3744_v5  ;;  %v3899_v55 = vld [vmem:[%s4583_s2] ss:$0 sm:$0xff] }
 0x12e   : > { %891 = vrot.lane.b32.xlu1 %v2855_v54, %s3196_s15  ;;  %v1133_v61 = vsel %vm1121_vm3, %v1112_v57, %v3758_v60  ;;  %s4602_s30 = smov (!%p242_p6, %s3885_s30), 15 }
 0x12f   : > { %813 = vrot.lane.b32.xlu0 %v2894_v52, %s3195_s10 }
 0x130   : > { %v1036_v0 = vpop.permute.xlu1 %1035 }
 0x131   : > { %v958_v2 = vpop.permute.xlu0 %957  ;;  %v1235_v3 = vsel %vm1226_vm8, %v1214_v58, %v1036_v0 }
 0x132   : > { %655 = vrot.lane.b32.xlu1 %v2855_v54, %s3193_s8  ;;  %3013 = vmatprep.mubr.msk.f32.mxu0 %vm1259_vm9, %v1235_v3  ;;  %v1215_v12 = vsel %vm1205_vm7, %v1194_v51, %v958_v2 }
 0x133   : > { %577 = vrot.lane.b32.xlu0 %v2894_v52, %s3191_s6 }
 0x134   : > { %v722_v23 = vpop.permute.xlu1 %721 }
 0x135   : > { %v3780_v4 = vpop.permute.xlu0 %483  ;;  %v1154_v58 = vsel %vm1142_vm4, %v1133_v61, %v722_v23 }
 0x136   : > { %971 = vrot.lane.b32.xlu1 %v2875_v7, %s3197_s27  ;;  %v1092_v59 = vsel %vm1079_vm1, %v3456_v62, %v3780_v4 }
 0x137   : > { %893 = vrot.lane.b32.xlu0 %v2856_v8, %s3196_s15 }
 0x138   : > { %v1038_v14 = vpop.permute.xlu1 %1037 }
 0x139   : > { %v800_v11 = vpop.permute.xlu0 %799  ;;  %v1236_v15 = vsel %vm1226_vm8, %v1215_v12, %v1038_v14 }
 0x13a   : > { %735 = vrot.lane.b32.xlu1 %v2875_v7, %s3194_s9  ;;  %3014 = vmatmul.mubr.msk.f32.gmra.mrb[8].mxu0 %vm1259_vm9, %v1236_v15  ;;  %v1174_v44 = vsel %vm1163_vm5, %v1153_v41, %v800_v11 }
 0x13b   : > { %657 = vrot.lane.b32.xlu0 %v2856_v8, %s3193_s8 }
 0x13c   : > { %v3795_v22 = vpop.permute.xlu1 %563 }
 0x13d   : > { %v3797_v24 = vpop.permute.xlu0 %485  ;;  %v1113_v51 = vsel %vm1100_vm2, %v1092_v59, %v3795_v22 }
 0x13e   : > { %1051 = vrot.lane.b32.xlu1 %v2895_v18, %s3198_s11  ;;  %v1093_v62 = vsel %vm1079_vm1, %v3481_v16, %v3797_v24 }
 0x13f   : > { %973 = vrot.lane.b32.xlu0 %v2876_v19, %s3197_s27 }
 0x140   : > { %v880_v26 = vpop.permute.xlu1 %879 }
 0x141   : > { %v802_v30 = vpop.permute.xlu0 %801  ;;  %v1195_v37 = vsel %vm1184_vm6, %v1174_v44, %v880_v26 }
 0x142   : > { %815 = vrot.lane.b32.xlu1 %v2895_v18, %s3195_s10  ;;  %v1175_v0 = vsel %vm1163_vm5, %v1154_v58, %v802_v30 }
 0x143   : > { %737 = vrot.lane.b32.xlu0 %v2876_v19, %s3194_s9 }
 0x144   : > { %v644_v13 = vpop.permute.xlu1 %643 }
 0x145   : > { %v3804_v21 = vpop.permute.xlu0 %565  ;;  %v1134_v12 = vsel %vm1121_vm3, %v1113_v51, %v644_v13 }
 0x146   : > { %817 = vrot.lane.b32.xlu1 %v2836_v32, %s3195_s10  ;;  %v1114_v4 = vsel %vm1100_vm2, %v1093_v62, %v3804_v21 }
 0x147   : > { %1053 = vrot.lane.b32.xlu0 %v2836_v32, %s3198_s11 }
 0x148   : > { %v960_v9 = vpop.permute.xlu1 %959 }
 0x149   : > { %v882_v20 = vpop.permute.xlu0 %881  ;;  %v1216_v42 = vsel %vm1205_vm7, %v1195_v37, %v960_v9 }
 0x14a   : > { %897 = vrot.lane.b32.xlu1 %v2858_v33, %s3196_s15  ;;  %v1196_v43 = vsel %vm1184_vm6, %v1175_v0, %v882_v20 }
 0x14b   : > { %895 = vrot.lane.b32.xlu0 %v2857_v36, %s3196_s15 }
 0x14c   : > { %v724_v49 = vpop.permute.xlu1 %723 }
 0x14d   : > { %v646_v52 = vpop.permute.xlu0 %645  ;;  %v1155_v15 = vsel %vm1142_vm4, %v1134_v12, %v724_v49 }
 0x14e   : > { %977 = vrot.lane.b32.xlu1 %v2878_v39, %s3197_s27  ;;  %v1135_v22 = vsel %vm1121_vm3, %v1114_v4, %v646_v52 }
 0x14f   : > { %975 = vrot.lane.b32.xlu0 %v2877_v40, %s3197_s27  ;;  %s3203_s27 = smov 64  }
 0x150   : > { %v1040_v53 = vpop.permute.xlu1 %1039 }
 0x151   : > { %v962_v54 = vpop.permute.xlu0 %961  ;;  %v1237_v35 = vsel %vm1226_vm8, %v1216_v42, %v1040_v53 }
 0x152   : > { %1057 = vrot.lane.b32.xlu1 %v2898_v25, %s3198_s11  ;;  %3016 = vmatprep.mubr.msk.f32.mxu0 %vm1259_vm9, %v1237_v35  ;;  %v1217_v45 = vsel %vm1205_vm7, %v1196_v43, %v962_v54 }
 0x153   : > { %1055 = vrot.lane.b32.xlu0 %v2897_v50, %s3198_s11  ;;  %v3890_v50 = vstv %s2921_s7 }
 0x154   : > { %v726_v29 = vpop.permute.xlu1 %725  ;;  %vm1520_vm11 = vcmp.ge.s32.totalorder %v3890_v50, 0  ;;  %vm1530_vm12 = vcmp.lt.s32.totalorder %v3890_v50, 16 }
 0x155   : > { %v488_v17 = vpop.permute.xlu0 %487  ;;  %v1156_v9 = vsel %vm1142_vm4, %v1135_v22, %v726_v29  ;;  %vm1540_vm13 = vmand %vm1520_vm11, %vm1530_vm12 }
 0x156   : > { %v1094_v25 = vsel %vm1079_vm1, %v3524_v48, %v488_v17 }
 0x158   : > { %v1042_v2 = vpop.permute.xlu1 %1041 }
 0x159   : > { %v804_v3 = vpop.permute.xlu0 %803  ;;  %v1238_v56 = vsel %vm1226_vm8, %v1217_v45, %v1042_v2 }
 0x15a   : > { %3017 = vmatmul.mubr.msk.f32.gmra.mrb[10].mxu0 %vm1259_vm9, %v1238_v56  ;;  %v1176_v18 = vsel %vm1163_vm5, %v1155_v15, %v804_v3 }
 0x15c   : > { %v568_v5 = vpop.permute.xlu1 %567 }
 0x15d   : > { %v3846_v6 = vpop.permute.xlu0 %489  ;;  %v1115_v42 = vsel %vm1100_vm2, %v1094_v25, %v568_v5 }
 0x15e   : > { %v1095_v5 = vsel %vm1079_vm1, %v3550_v63, %v3846_v6 }
 0x160   : > { %v884_v60 = vpop.permute.xlu1 %883 }
 0x161   : > { %v806_v7 = vpop.permute.xlu0 %805  ;;  %v1197_v19 = vsel %vm1184_vm6, %v1176_v18, %v884_v60 }
 0x162   : > { %v1177_v20 = vsel %vm1163_vm5, %v1156_v9, %v806_v7 }
 0x164   : > { %v648_v8 = vpop.permute.xlu1 %647 }
 0x165   : > { %v3848_v10 = vpop.permute.xlu0 %569  ;;  %v1136_v53 = vsel %vm1121_vm3, %v1115_v42, %v648_v8 }
 0x166   : > { %v1116_v7 = vsel %vm1100_vm2, %v1095_v5, %v3848_v10 }
 0x168   : > { %v964_v23 = vpop.permute.xlu1 %963 }
 0x169   : > { %v886_v31 = vpop.permute.xlu0 %885  ;;  %v1218_v26 = vsel %vm1205_vm7, %v1197_v19, %v964_v23 }
 0x16a   : > { %v1198_v34 = vsel %vm1184_vm6, %v1177_v20, %v886_v31 }
 0x16c   : > { %v728_v14 = vpop.permute.xlu1 %727 }
 0x16d   : > { %v650_v11 = vpop.permute.xlu0 %649  ;;  %v1157_v57 = vsel %vm1142_vm4, %v1136_v53, %v728_v14 }
 0x16e   : > { %v1137_v23 = vsel %vm1121_vm3, %v1116_v7, %v650_v11 }
 0x170   : > { %v1044_v30 = vpop.permute.xlu1 %1043 }
 0x171   : > { %v966_v32 = vpop.permute.xlu0 %965  ;;  %v1239_v33 = vsel %vm1226_vm8, %v1218_v26, %v1044_v30 }
 0x172   : > { %3019 = vmatprep.mubr.msk.f32.mxu0 %vm1259_vm9, %v1239_v33  ;;  %v1219_v38 = vsel %vm1205_vm7, %v1198_v34, %v966_v32  ;;  %v1511_v34 = vadd.s32 1, %v3890_v50 }
 0x174   : > { %v730_v13 = vpop.permute.xlu1 %729  ;;  %vm1521_vm14 = vcmp.ge.s32.totalorder %v1511_v34, 0  ;;  %vm1531_vm15 = vcmp.lt.s32.totalorder %v1511_v34, 16 }
 0x175   : > { %v3868_v36 = vpop.permute.xlu0 %491  ;;  %v1158_v12 = vsel %vm1142_vm4, %v1137_v23, %v730_v13  ;;  %vm1541_vm0 = vmand %vm1521_vm14, %vm1531_vm15 }
 0x178   : > { %v1046_v16 = vpop.permute.xlu1 %1045 }
 0x179   : > { %v808_v24 = vpop.permute.xlu0 %807  ;;  %v1240_v39 = vsel %vm1226_vm8, %v1219_v38, %v1046_v16  ;;  %v1096_v38 = vsel %vm1079_vm1, %v3593_v28, %v3868_v36 }
 0x17a   : > { %3020 = vmatmul.mubr.msk.f32.gmra.mrb[12].mxu0 %vm1259_vm9, %v1240_v39  ;;  %v1178_v48 = vsel %vm1163_vm5, %v1157_v57, %v808_v24 }
 0x17c   : > { %v3876_v21 = vpop.permute.xlu1 %571 }
 0x17d   : > { %v3878_v40 = vpop.permute.xlu0 %493  ;;  %v1117_v16 = vsel %vm1100_vm2, %v1096_v38, %v3876_v21 }
 0x180   : > { %v888_v46 = vpop.permute.xlu1 %887 }
 0x181   : > { %v810_v49 = vpop.permute.xlu0 %809  ;;  %v1199_v29 = vsel %vm1184_vm6, %v1178_v48, %v888_v46  ;;  %v1097_v48 = vsel %vm1079_vm1, %v3618_v47, %v3878_v40 }
 0x182   : > { %v1179_v63 = vsel %vm1163_vm5, %v1158_v12, %v810_v49 }
 0x184   : > { %v3880_v52 = vpop.permute.xlu1 %651 }
 0x185   : > { %v3882_v41 = vpop.permute.xlu0 %573  ;;  %v1138_v24 = vsel %vm1121_vm3, %v1117_v16, %v3880_v52 }
 0x188   : > { %v968_v44 = vpop.permute.xlu1 %967 }
 0x189   : > { %v890_v37 = vpop.permute.xlu0 %889  ;;  %v1220_v0 = vsel %vm1205_vm7, %v1199_v29, %v968_v44  ;;  %v1118_v29 = vsel %vm1100_vm2, %v1097_v48, %v3882_v41 }
 0x18a   : > { %v1200_v6 = vsel %vm1184_vm6, %v1179_v63, %v890_v37 }
 0x18c   : > { %v732_v54 = vpop.permute.xlu1 %731 }
 0x18d   : > { %v3894_v35 = vpop.permute.xlu0 %653  ;;  %v3003_v61 = vpop.f32.mrb[0].mxu0  ;;  %v1159_v49 = vsel %vm1142_vm4, %v1138_v24, %v732_v54 }
 0x18e   : > { %v1396_v17 = vadd.f32 %v3003_v61, %v3899_v55  ;;  %v1390_v58 = vpop.f32.mrb[1].mxu0 }
 0x18f   : > { %v1391_v43 = vadd.f32 %v3899_v55, %v1390_v58  ;;  %v1139_v58 = vsel %vm1121_vm3, %v1118_v29, %v3894_v35  ;;  %v2427_v29 = vld [vmem:[%s4584_s3 + $0x30] sm:$0xff] }
 0x190   : > { %v1048_v45 = vpop.permute.xlu1 %1047  ;;  %v1490_v3 = vmax.f32 %v1396_v17, 0.0 }
 0x191   : > { %v970_v2 = vpop.permute.xlu0 %969  ;;  %v1241_v56 = vsel %vm1226_vm8, %v1220_v0, %v1048_v45  ;;  %v1489_v60 = vmax.f32 %v1391_v43, 0.0 }
 0x192   : > { %3022 = vmatprep.mubr.msk.f32.mxu0 %vm1259_vm9, %v1241_v56  ;;  %v1571_v8 = vsel %vm1540_vm13, %v1490_v3, 0.0  ;;  %v1221_v14 = vsel %vm1205_vm7, %v1200_v6, %v970_v2 }
 0x193   : > { %1612 = vst.msk [vmem:[#allocation2 + $0x9] sm:$0xff] %vm1100_vm2, %v1571_v8  ;;  %v1570_v31 = vsel %vm1540_vm13, %v1489_v60, 0.0 }
 0x194   : > { %v734_v59 = vpop.permute.xlu1 %733  ;;  %1611 = vst.msk [vmem:[#allocation2 + $0x1] sm:$0xff] %vm1100_vm2, %v1570_v31 }
 0x195   : > { %v3918_v51 = vpop.permute.xlu0 %495  ;;  %v1160_v2 = vsel %vm1142_vm4, %v1139_v58, %v734_v59 }
 0x196   : > { %v1098_v23 = vsel %vm1079_vm1, %v3663_v1, %v3918_v51 }
 0x198   : > { %v1050_v10 = vpop.permute.xlu1 %1049 }
 0x199   : > { %v812_v15 = vpop.permute.xlu0 %811  ;;  %v1242_v11 = vsel %vm1226_vm8, %v1221_v14, %v1050_v10 }
 0x19a   : > { %3023 = vmatmul.mubr.msk.f32.gmra.mrb[14].mxu0 %vm1259_vm9, %v1242_v11  ;;  %v1648_v18 = vld [vmem:[#allocation2 + $0x9] sm:$0xff]  ;;  %v1180_v44 = vsel %vm1163_vm5, %v1159_v49, %v812_v15 }
 0x19b   : > { %1795 = vrot.lane.b32.xlu1 %v1648_v18, %s3191_s6  ;;  %v1647_v30 = vld [vmem:[#allocation2 + $0x1] sm:$0xff]  ;;  %v1664_v32 = vld [vmem:[#allocation2 + $0xa] sm:$0xff] }
 0x19c   : > { %v3928_v19 = vpop.permute.xlu1 %575  ;;  %1793 = vrot.lane.b32.xlu0 %v1647_v30, %s3191_s6  ;;  %v1663_v4 = vld [vmem:[#allocation2 + $0x2] sm:$0xff] }
 0x19d   : > { %v498_v26 = vpop.permute.xlu0 %497  ;;  %v1119_v59 = vsel %vm1100_vm2, %v1098_v23, %v3928_v19 }
 0x19e   : > { %v1099_v31 = vsel %vm1079_vm1, %v3690_v27, %v498_v26 }
 0x19f   : > { %1859 = vrot.lane.b32.xlu1 %v1664_v32, %s3194_s9 }
 0x1a0   : > { %v892_v33 = vpop.permute.xlu1 %891  ;;  %1857 = vrot.lane.b32.xlu0 %v1663_v4, %s3194_s9 }
 0x1a1   : > { %v814_v62 = vpop.permute.xlu0 %813  ;;  %v1201_v25 = vsel %vm1184_vm6, %v1180_v44, %v892_v33 }
 0x1a2   : > { %v1181_v47 = vsel %vm1163_vm5, %v1160_v2, %v814_v62 }
 0x1a4   : > { %v656_v22 = vpop.permute.xlu1 %655 }
 0x1a5   : > { %v578_v13 = vpop.permute.xlu0 %577  ;;  %v1140_v63 = vsel %vm1121_vm3, %v1119_v59, %v656_v22 }
 0x1a6   : > { %v1120_v12 = vsel %vm1100_vm2, %v1099_v31, %v578_v13 }
 0x1a8   : > { %v972_v9 = vpop.permute.xlu1 %971 }
 0x1a9   : > { %v894_v20 = vpop.permute.xlu0 %893  ;;  %v1222_v36 = vsel %vm1205_vm7, %v1201_v25, %v972_v9  ;;  %v1512_v9 = vadd.s32 2, %v3890_v50  ;;  %v2422_v25 = vld [vmem:[%s4584_s3 + $0x8] sm:$0xff] }
 0x1aa   : > { %v1202_v40 = vsel %vm1184_vm6, %v1181_v47, %v894_v20 }
 0x1ab   : > { %vm1522_vm1 = vcmp.ge.s32.totalorder %v1512_v9, 0 }
 0x1ac   : > { %v736_v39 = vpop.permute.xlu1 %735 }
 0x1ad   : > { %v658_v46 = vpop.permute.xlu0 %657  ;;  %v3006_v37 = vpop.f32.mrb[2].mxu0  ;;  %v1161_v11 = vsel %vm1142_vm4, %v1140_v63, %v736_v39  ;;  %v1514_v63 = vadd.s32 4, %v3890_v50 }
 0x1ae   : > { %v1406_v42 = vadd.f32 %v3006_v37, %v3899_v55  ;;  %v1400_v28 = vpop.f32.mrb[3].mxu0  ;;  %v1141_v6 = vsel %vm1121_vm3, %v1120_v12, %v658_v46  ;;  %vm1532_vm3 = vcmp.lt.s32.totalorder %v1512_v9, 16  ;;  %v2421_v37 = vld [vmem:[%s4584_s3] sm:$0xff] }
 0x1af   : > { %v1401_v21 = vadd.f32 %v3899_v55, %v1400_v28  ;;  %v2423_v28 = vld [vmem:[%s4584_s3 + $0x10] sm:$0xff]  ;;  %vm1524_vm11 = vcmp.ge.s32.totalorder %v1514_v63, 0  ;;  %vm1534_vm12 = vcmp.lt.s32.totalorder %v1514_v63, 16 }
 0x1b0   : > { %v1052_v52 = vpop.permute.xlu1 %1051  ;;  %v1492_v57 = vmax.f32 %v1406_v42, 0.0  ;;  %v3081_v42 = vpack.c.bf16 %v2422_v25, %v2421_v37  ;;  %vm1544_vm13 = vmand %vm1524_vm11, %vm1534_vm12  ;;  %vm2387_vm11 = vcmask 457728   ;;  %vm2437_vm12 = vcmask 588800  }
 0x1b1   : > { %v974_v53 = vpop.permute.xlu0 %973  ;;  %v1243_v54 = vsel %vm1226_vm8, %v1222_v36, %v1052_v52  ;;  %v1491_v61 = vmax.f32 %v1401_v21, 0.0  ;;  %v2424_v36 = vld [vmem:[%s4584_s3 + $0x18] sm:$0xff] }
 0x1b2   : > { %3025 = vmatprep.mubr.msk.f32.mxu0 %vm1259_vm9, %v1243_v54  ;;  %v1573_v17 = vsel %vm1541_vm0, %v1492_v57, 0.0  ;;  %v1223_v3 = vsel %vm1205_vm7, %v1202_v40, %v974_v53  ;;  %3082 = vmatprep.subr.bf16.mxu1 %v3081_v42  ;;  %v3085_v21 = vpack.c.bf16 %v2424_v36, %v2423_v28  ;;  %v2425_v53 = vld [vmem:[%s4584_s3 + $0x20] sm:$0xff]  ;;  %v2426_v57 = vld [vmem:[%s4584_s3 + $0x28] sm:$0xff] }
 0x1b3   : > { %1614 = vst.msk [vmem:[#allocation2 + $0x21] sm:$0xff] %vm1100_vm2, %v1573_v17  ;;  %v1572_v0 = vsel %vm1541_vm0, %v1491_v61, 0.0  ;;  %3084 = vmatpush3.bf16.msra.mxu1 %v3081_v42  ;;  %v3089_v54 = vpack.c.bf16 %v2426_v57, %v2425_v53  ;;  %v2428_v17 = vld [vmem:[%s4584_s3 + $0x38] sm:$0xff] }
 0x1b4   : > { %v816_v43 = vpop.permute.xlu1 %815  ;;  %1613 = vst.msk [vmem:[#allocation2 + $0x19] sm:$0xff] %vm1100_vm2, %v1572_v0  ;;  %3086 = vmatprep.subr.bf16.mxu1 %v3085_v21  ;;  %v3093_v58 = vpack.c.bf16 %v2428_v17, %v2427_v29  ;;  %v2429_v0 = vld [vmem:[%s4584_s3 + $0x40] sm:$0xff] }
 0x1b5   : > { %v738_v45 = vpop.permute.xlu0 %737  ;;  %v1182_v27 = vsel %vm1163_vm5, %v1161_v11, %v816_v43 }
 0x1b6   : > { %v1162_v1 = vsel %vm1142_vm4, %v1141_v6, %v738_v45  ;;  %v1513_v45 = vadd.s32 3, %v3890_v50 }
 0x1b7   : > { %3088 = vmatpush3.bf16.msra.mxu1 %v3085_v21 }
 0x1b8   : > { %v818_v41 = vpop.permute.xlu1 %817  ;;  %3090 = vmatprep.subr.bf16.mxu1 %v3089_v54 }
 0x1b9   : > { %v1054_v56 = vpop.permute.xlu0 %1053  ;;  %v1183_v51 = vsel %vm1163_vm5, %v1162_v1, %v818_v41  ;;  %vm1542_vm5 = vmand %vm1522_vm1, %vm1532_vm3 }
 0x1ba   : > { %v1244_v5 = vsel %vm1226_vm8, %v1223_v3, %v1054_v56  ;;  %v1697_v35 = vld [vmem:[#allocation2 + $0x21] sm:$0xff] }
 0x1bb   : > { %3026 = vmatmul.mubr.msk.f32.gmra.mrb[16].mxu0 %vm1259_vm9, %v1244_v5  ;;  %1987 = vrot.lane.b32.xlu0 %v1697_v35, %s3198_s11  ;;  %v3965_v8 = vld [vmem:[#allocation2 + $0x20] sm:$0xff]  ;;  %v3998_v20 = vld [vmem:[#allocation2 + $0x18] sm:$0xff] }
 0x1bc   : > { %v898_v60 = vpop.permute.xlu1 %897  ;;  %1923 = vrot.lane.b32.xlu1 %v3965_v8, %s3196_s15  ;;  %v1649_v15 = vld [vmem:[#allocation2 + $0x19] sm:$0xff]  ;;  %v1713_v26 = vld [vmem:[#allocation2 + $0x22] sm:$0xff]  ;;  %3092 = vmatpush3.bf16.msra.mxu1 %v3089_v54 }
 0x1bd   : > { %v896_v7 = vpop.permute.xlu0 %895  ;;  %v1204_v18 = vsel %vm1184_vm6, %v1183_v51, %v898_v60  ;;  %v1712_v4 = vld [vmem:[#allocation2 + $0x1a] sm:$0xff]  ;;  %3094 = vmatprep.subr.bf16.mxu1 %v3093_v58 }
 0x1be   : > { %v1203_v19 = vsel %vm1184_vm6, %v1182_v27, %v896_v7 }
 0x1bf   : > { %1799 = vrot.lane.b32.xlu0 %v1697_v35, %s3191_s6 }
 0x1c0   : > { %v978_v14 = vpop.permute.xlu1 %977  ;;  %1797 = vrot.lane.b32.xlu1 %v1649_v15, %s3191_s6  ;;  %3096 = vmatpush3.bf16.msra.mxu1 %v3093_v58 }
 0x1c1   : > { %v976_v10 = vpop.permute.xlu0 %975  ;;  %v1225_v30 = vsel %vm1205_vm7, %v1204_v18, %v978_v14  ;;  %3047 = vmatprep.subr.mxu1 %v2429_v0 }
 0x1c2   : > { %v1224_v32 = vsel %vm1205_vm7, %v1203_v19, %v976_v10  ;;  %vm1523_vm7 = vcmp.ge.s32.totalorder %v1513_v45, 0 }
 0x1c3   : > { %2051 = vrot.lane.b32.xlu0 %v1713_v26, %s3200_s18 }
 0x1c4   : > { %v1058_v33 = vpop.permute.xlu1 %1057  ;;  %2049 = vrot.lane.b32.xlu1 %v1712_v4, %s3200_s18  ;;  %3048 = vmatpush3.msra.mxu1 %v2429_v0 }
 0x1c5   : > { %v1056_v62 = vpop.permute.xlu0 %1055  ;;  %v1246_v22 = vsel %vm1226_vm8, %v1225_v30, %v1058_v33 }
 0x1c6   : > { %v1245_v13 = vsel %vm1226_vm8, %v1224_v32, %v1056_v62 }
 0x1c7   : > { %3028 = vmatprep.mubr.msk.f32.mxu0 %vm1259_vm9, %v1245_v13  ;;  %1863 = vrot.lane.b32.xlu0 %v1713_v26, %s3194_s9 }
 0x1c8   : > { %3029 = vmatmul.mubr.msk.f32.gmra.mrb[18].mxu0 %vm1259_vm9, %v1246_v22  ;;  %1861 = vrot.lane.b32.xlu1 %v1712_v4, %s3194_s9  ;;  %vm1533_vm9 = vcmp.lt.s32.totalorder %v1513_v45, 16  ;;  %v1515_v4 = vadd.s32 5, %v3890_v50 }
 0x1c9   : > { %vm1543_vm10 = vmand %vm1523_vm7, %vm1533_vm9  ;;  %vm2370_vm7 = vcmask 392192   ;;  %vm2353_vm9 = vcmask 326656  }
 0x1ca   : > { %vm1525_vm14 = vcmp.ge.s32.totalorder %v1515_v4, 0  ;;  %vm1535_vm15 = vcmp.lt.s32.totalorder %v1515_v4, 16 }
 0x1cb   : > { %1921 = vrot.lane.b32.xlu0 %v3998_v20, %s3196_s15  ;;  %vm1545_vm0 = vmand %vm1525_vm14, %vm1535_vm15 }
 0x1cd   : > { %v3009_v34 = vpop.f32.mrb[4].mxu0 }
 0x1ce   : > { %v1416_v38 = vadd.f32 %v3009_v34, %v3899_v55  ;;  %v1410_v16 = vpop.f32.mrb[5].mxu0 }
 0x1cf   : > { %v1411_v24 = vadd.f32 %v3899_v55, %v1410_v16  ;;  %1985 = vrot.lane.b32.xlu0 %v1649_v15, %s3198_s11 }
 0x1d0   : > { %v1494_v39 = vmax.f32 %v1416_v38, 0.0 }
 0x1d1   : > { %v1493_v46 = vmax.f32 %v1411_v24, 0.0 }
 0x1d2   : > { %v1575_v49 = vsel %vm1542_vm5, %v1494_v39, 0.0 }
 0x1d3   : > { %1616 = vst.msk [vmem:[#allocation2 + $0x39] sm:$0xff] %vm1100_vm2, %v1575_v49  ;;  %v1574_v44 = vsel %vm1542_vm5, %v1493_v46, 0.0 }
 0x1d4   : > { %1615 = vst.msk [vmem:[#allocation2 + $0x31] sm:$0xff] %vm1100_vm2, %v1574_v44 }
 0x1da   : > { %v1699_v52 = vld [vmem:[#allocation2 + $0x39] sm:$0xff] }
 0x1db   : > { %1991 = vrot.lane.b32.xlu1 %v1699_v52, %s3198_s11  ;;  %2179 = vrot.lane.b32.xlu0 %v1699_v52, %s3201_s28  ;;  %v4027_v48 = vld [vmem:[#allocation2 + $0x30] sm:$0xff]  ;;  %v4029_v61 = vld [vmem:[#allocation2 + $0x38] sm:$0xff] }
 0x1dc   : > { %v1745_v43 = vld [vmem:[#allocation2 + $0x31] sm:$0xff]  ;;  %v1762_v60 = vld [vmem:[#allocation2 + $0x3a] sm:$0xff] }
 0x1dd   : > { %v1714_v2 = vld [vmem:[#allocation2 + $0x32] sm:$0xff] }
 0x1df   : > { %2113 = vrot.lane.b32.xlu1 %v4027_v48, %s3202_s12  ;;  %2115 = vrot.lane.b32.xlu0 %v4029_v61, %s3202_s12 }
 0x1e3   : > { %1925 = vrot.lane.b32.xlu1 %v4027_v48, %s3196_s15  ;;  %1927 = vrot.lane.b32.xlu0 %v4029_v61, %s3196_s15 }
 0x1e7   : > { %2177 = vrot.lane.b32.xlu1 %v1745_v43, %s3201_s28  ;;  %1801 = vrot.lane.b32.xlu0 %v1745_v43, %s3191_s6 }
 0x1eb   : > { %1989 = vrot.lane.b32.xlu1 %v1745_v43, %s3198_s11  ;;  %2053 = vrot.lane.b32.xlu0 %v1714_v2, %s3200_s18  ;;  %v1516_v43 = vadd.s32 6, %v3890_v50 }
 0x1ed   : > { %v3012_v47 = vpop.f32.mrb[6].mxu0  ;;  %vm1526_vm1 = vcmp.ge.s32.totalorder %v1516_v43, 0  ;;  %vm1536_vm3 = vcmp.lt.s32.totalorder %v1516_v43, 16  ;;  %v1517_v43 = vadd.s32 7, %v3890_v50 }
 0x1ee   : > { %v1426_v40 = vadd.f32 %v3012_v47, %v3899_v55  ;;  %v1420_v3 = vpop.f32.mrb[7].mxu0  ;;  %vm1546_vm5 = vmand %vm1526_vm1, %vm1536_vm3 }
 0x1ef   : > { %v1421_v41 = vadd.f32 %v3899_v55, %v1420_v3  ;;  %2241 = vrot.lane.b32.xlu1 %v1714_v2, %s3203_s27  ;;  %1803 = vrot.lane.b32.xlu0 %v1699_v52, %s3191_s6  ;;  %vm1537_vm14 = vcmp.lt.s32.totalorder %v1517_v43, 16 }
 0x1f0   : > { %v1496_v56 = vmax.f32 %v1426_v40, 0.0 }
 0x1f1   : > { %v1495_v5 = vmax.f32 %v1421_v41, 0.0 }
 0x1f2   : > { %v1577_v35 = vsel %vm1543_vm10, %v1496_v56, 0.0 }
 0x1f3   : > { %1618 = vst.msk [vmem:[#allocation2 + $0x51] sm:$0xff] %vm1100_vm2, %v1577_v35  ;;  %v1576_v7 = vsel %vm1543_vm10, %v1495_v5, 0.0  ;;  %2243 = vrot.lane.b32.xlu1 %v1762_v60, %s3203_s27  ;;  %2055 = vrot.lane.b32.xlu0 %v1762_v60, %s3200_s18  ;;  %vm2404_vm10 = vcmask 523264  }
 0x1f4   : > { %1617 = vst.msk [vmem:[#allocation2 + $0x49] sm:$0xff] %vm1100_vm2, %v1576_v7 }
 0x1f7   : > { %1865 = vrot.lane.b32.xlu1 %v1714_v2, %s3194_s9  ;;  %1867 = vrot.lane.b32.xlu0 %v1762_v60, %s3194_s9 }
 0x1fa   : > { %v1748_v12 = vld [vmem:[#allocation2 + $0x51] sm:$0xff] }
 0x1fb   : > { %v4063_v23 = vld [vmem:[#allocation2 + $0x48] sm:$0xff]  ;;  %v4065_v31 = vld [vmem:[#allocation2 + $0x50] sm:$0xff] }
 0x1fc   : > { %2117 = vrot.lane.b32.xlu1 %v4063_v23, %s3202_s12  ;;  %2119 = vrot.lane.b32.xlu0 %v4065_v31, %s3202_s12  ;;  %v1747_v59 = vld [vmem:[#allocation2 + $0x49] sm:$0xff]  ;;  %v1764_v19 = vld [vmem:[#allocation2 + $0x52] sm:$0xff] }
 0x1fd   : > { %v1763_v6 = vld [vmem:[#allocation2 + $0x4a] sm:$0xff] }
 0x200   : > { %1929 = vrot.lane.b32.xlu1 %v4063_v23, %s3196_s15  ;;  %1931 = vrot.lane.b32.xlu0 %v4065_v31, %s3196_s15 }
 0x204   : > { %2181 = vrot.lane.b32.xlu1 %v1747_v59, %s3201_s28  ;;  %2183 = vrot.lane.b32.xlu0 %v1748_v12, %s3201_s28 }
 0x208   : > { %1993 = vrot.lane.b32.xlu1 %v1747_v59, %s3198_s11  ;;  %1805 = vrot.lane.b32.xlu0 %v1747_v59, %s3191_s6 }
 0x20c   : > { %2245 = vrot.lane.b32.xlu1 %v1763_v6, %s3203_s27  ;;  %2057 = vrot.lane.b32.xlu0 %v1763_v6, %s3200_s18 }
 0x20d   : > { %v3015_v14 = vpop.f32.mrb[8].mxu0  ;;  %v4113_v9 = vpop.permute.xlu1 %1795 }
 0x20e   : > { %v1436_v10 = vadd.f32 %v3015_v14, %v3899_v55  ;;  %v1430_v15 = vpop.f32.mrb[9].mxu0  ;;  %v4104_v32 = vpop.permute.xlu0 %1793 }
 0x20f   : > { %v1431_v11 = vadd.f32 %v3899_v55, %v1430_v15 }
 0x210   : > { %v1498_v1 = vmax.f32 %v1436_v10, 0.0  ;;  %1995 = vrot.lane.b32.xlu1 %v1748_v12, %s3198_s11  ;;  %1807 = vrot.lane.b32.xlu0 %v1748_v12, %s3191_s6 }
 0x211   : > { %v1497_v27 = vmax.f32 %v1431_v11, 0.0  ;;  %v4126_v42 = vpop.permute.xlu1 %1859  ;;  %v1631_v11 = vld [vmem:[#allocation2] sm:$0xff] }
 0x212   : > { %v1579_v51 = vsel %vm1544_vm13, %v1498_v1, 0.0  ;;  %v4111_v22 = vpop.permute.xlu0 %1857  ;;  %v2289_v1 = vsel %vm1100_vm2, %v1631_v11, %v4104_v32 }
 0x213   : > { %1620 = vst.msk [vmem:[#allocation2 + $0x69] sm:$0xff] %vm1100_vm2, %v1579_v51  ;;  %v1578_v18 = vsel %vm1544_vm13, %v1497_v27, 0.0  ;;  %vm1527_vm13 = vcmp.ge.s32.totalorder %v1517_v43, 0 }
 0x214   : > { %1619 = vst.msk [vmem:[#allocation2 + $0x61] sm:$0xff] %vm1100_vm2, %v1578_v18  ;;  %2247 = vrot.lane.b32.xlu1 %v1764_v19, %s3203_s27  ;;  %2059 = vrot.lane.b32.xlu0 %v1764_v19, %s3200_s18  ;;  %v1632_v18 = vld [vmem:[#allocation2 + $0x8] sm:$0xff]  ;;  %vm1547_vm15 = vmand %vm1527_vm13, %vm1537_vm14 }
 0x218   : > { %1869 = vrot.lane.b32.xlu1 %v1763_v6, %s3194_s9  ;;  %1871 = vrot.lane.b32.xlu0 %v1764_v19, %s3194_s9  ;;  %v2305_v19 = vsel %vm1142_vm4, %v2289_v1, %v4111_v22 }
 0x21a   : > { %v1750_v62 = vld [vmem:[#allocation2 + $0x69] sm:$0xff] }
 0x21b   : > { %v4092_v26 = vld [vmem:[#allocation2 + $0x60] sm:$0xff]  ;;  %v4094_v30 = vld [vmem:[#allocation2 + $0x68] sm:$0xff] }
 0x21c   : > { %2121 = vrot.lane.b32.xlu1 %v4092_v26, %s3202_s12  ;;  %2123 = vrot.lane.b32.xlu0 %v4094_v30, %s3202_s12  ;;  %v1749_v33 = vld [vmem:[#allocation2 + $0x61] sm:$0xff]  ;;  %v1766_v28 = vld [vmem:[#allocation2 + $0x6a] sm:$0xff] }
 0x21d   : > { %v1765_v13 = vld [vmem:[#allocation2 + $0x62] sm:$0xff] }
 0x220   : > { %1933 = vrot.lane.b32.xlu1 %v4092_v26, %s3196_s15  ;;  %1935 = vrot.lane.b32.xlu0 %v4094_v30, %s3196_s15 }
 0x224   : > { %2185 = vrot.lane.b32.xlu1 %v1749_v33, %s3201_s28  ;;  %2187 = vrot.lane.b32.xlu0 %v1750_v62, %s3201_s28 }
 0x228   : > { %1997 = vrot.lane.b32.xlu1 %v1749_v33, %s3198_s11  ;;  %1809 = vrot.lane.b32.xlu0 %v1749_v33, %s3191_s6  ;;  %v2290_v33 = vsel %vm1100_vm2, %v1632_v18, %v4113_v9 }
 0x22c   : > { %2249 = vrot.lane.b32.xlu1 %v1765_v13, %s3203_s27  ;;  %2061 = vrot.lane.b32.xlu0 %v1765_v13, %s3200_s18 }
 0x22d   : > { %v3018_v34 = vpop.f32.mrb[10].mxu0  ;;  %v4118_v16 = vpop.permute.xlu0 %1987 }
 0x22e   : > { %v1446_v38 = vadd.f32 %v3018_v34, %v3899_v55  ;;  %v1440_v24 = vpop.f32.mrb[11].mxu0  ;;  %v4131_v36 = vpop.permute.xlu1 %1923  ;;  %v2306_v34 = vsel %vm1142_vm4, %v2290_v33, %v4126_v42 }
 0x22f   : > { %v1441_v39 = vadd.f32 %v3899_v55, %v1440_v24  ;;  %v2322_v22 = vsel %vm1184_vm6, %v2306_v34, %v4131_v36 }
 0x230   : > { %v1500_v46 = vmax.f32 %v1446_v38, 0.0  ;;  %1999 = vrot.lane.b32.xlu1 %v1750_v62, %s3198_s11  ;;  %1811 = vrot.lane.b32.xlu0 %v1750_v62, %s3191_s6 }
 0x231   : > { %v1499_v49 = vmax.f32 %v1441_v39, 0.0  ;;  %v4123_v37 = vpop.permute.xlu0 %1799  ;;  %v2338_v39 = vsel %vm1226_vm8, %v2322_v22, %v4118_v16 }
 0x232   : > { %v1581_v44 = vsel %vm1545_vm0, %v1500_v46, 0.0  ;;  %v4145_v57 = vpop.permute.xlu1 %1797 }
 0x233   : > { %1622 = vst.msk [vmem:[#allocation2 + $0x81] sm:$0xff] %vm1100_vm2, %v1581_v44  ;;  %v1580_v25 = vsel %vm1545_vm0, %v1499_v49, 0.0 }
 0x234   : > { %1621 = vst.msk [vmem:[#allocation2 + $0x79] sm:$0xff] %vm1100_vm2, %v1580_v25  ;;  %2251 = vrot.lane.b32.xlu1 %v1766_v28, %s3203_s27  ;;  %2063 = vrot.lane.b32.xlu0 %v1766_v28, %s3200_s18 }
 0x235   : > { %v4133_v21 = vpop.permute.xlu0 %2051 }
 0x236   : > { %v2050_v29 = vpop.permute.xlu1 %2049  ;;  %v2355_v49 = vsel %vm2353_vm9, %v2338_v39, %v4133_v21 }
 0x238   : > { %1873 = vrot.lane.b32.xlu1 %v1765_v13, %s3194_s9  ;;  %1875 = vrot.lane.b32.xlu0 %v1766_v28, %s3194_s9 }
 0x239   : > { %v4147_v54 = vpop.permute.xlu0 %1863 }
 0x23a   : > { %v1752_v0 = vld [vmem:[#allocation2 + $0x81] sm:$0xff]  ;;  %v4158_v45 = vpop.permute.xlu1 %1861 }
 0x23b   : > { %v4137_v52 = vld [vmem:[#allocation2 + $0x78] sm:$0xff]  ;;  %v4139_v53 = vld [vmem:[#allocation2 + $0x80] sm:$0xff] }
 0x23c   : > { %2125 = vrot.lane.b32.xlu1 %v4137_v52, %s3202_s12  ;;  %2127 = vrot.lane.b32.xlu0 %v4139_v53, %s3202_s12  ;;  %v1751_v58 = vld [vmem:[#allocation2 + $0x79] sm:$0xff]  ;;  %v1768_v14 = vld [vmem:[#allocation2 + $0x82] sm:$0xff] }
 0x23d   : > { %v1922_v17 = vpop.permute.xlu0 %1921  ;;  %v1767_v47 = vld [vmem:[#allocation2 + $0x7a] sm:$0xff] }
 0x23e   : > { %v2321_v62 = vsel %vm1184_vm6, %v2305_v19, %v1922_v17 }
 0x240   : > { %1937 = vrot.lane.b32.xlu1 %v4137_v52, %s3196_s15  ;;  %1939 = vrot.lane.b32.xlu0 %v4139_v53, %s3196_s15 }
 0x241   : > { %v1986_v2 = vpop.permute.xlu0 %1985 }
 0x242   : > { %v2337_v32 = vsel %vm1226_vm8, %v2321_v62, %v1986_v2 }
 0x243   : > { %v2354_v24 = vsel %vm2353_vm9, %v2337_v32, %v2050_v29 }
 0x244   : > { %2189 = vrot.lane.b32.xlu1 %v1751_v58, %s3201_s28  ;;  %2191 = vrot.lane.b32.xlu0 %v1752_v0, %s3201_s28 }
 0x248   : > { %2001 = vrot.lane.b32.xlu1 %v1751_v58, %s3198_s11  ;;  %1813 = vrot.lane.b32.xlu0 %v1751_v58, %s3191_s6 }
 0x24c   : > { %2253 = vrot.lane.b32.xlu1 %v1767_v47, %s3203_s27  ;;  %2065 = vrot.lane.b32.xlu0 %v1767_v47, %s3200_s18 }
 0x24d   : > { %v3021_v40 = vpop.f32.mrb[12].mxu0  ;;  %v4163_v41 = vpop.permute.xlu1 %1991 }
 0x24e   : > { %v1456_v3 = vadd.f32 %v3021_v40, %v3899_v55  ;;  %v2180_v56 = vpop.permute.xlu0 %2179  ;;  %v1450_v5 = vpop.f32.mrb[13].mxu0 }
 0x24f   : > { %v1451_v60 = vadd.f32 %v3899_v55, %v1450_v5 }
 0x250   : > { %v1502_v35 = vmax.f32 %v1456_v3, 0.0  ;;  %2003 = vrot.lane.b32.xlu1 %v1752_v0, %s3198_s11  ;;  %1815 = vrot.lane.b32.xlu0 %v1752_v0, %s3191_s6 }
 0x251   : > { %v1501_v59 = vmax.f32 %v1451_v60, 0.0  ;;  %v2114_v12 = vpop.permute.xlu1 %2113 }
 0x252   : > { %v1583_v7 = vsel %vm1546_vm5, %v1502_v35, 0.0  ;;  %v2116_v63 = vpop.permute.xlu0 %2115  ;;  %v2371_v46 = vsel %vm2370_vm7, %v2354_v24, %v2114_v12 }
 0x253   : > { %1624 = vst.msk [vmem:[#allocation2 + $0x99] sm:$0xff] %vm1100_vm2, %v1583_v7  ;;  %v1582_v6 = vsel %vm1546_vm5, %v1501_v59, 0.0  ;;  %v2372_v16 = vsel %vm2370_vm7, %v2355_v49, %v2116_v63 }
 0x254   : > { %1623 = vst.msk [vmem:[#allocation2 + $0x91] sm:$0xff] %vm1100_vm2, %v1582_v6  ;;  %2255 = vrot.lane.b32.xlu1 %v1768_v14, %s3203_s27  ;;  %2067 = vrot.lane.b32.xlu0 %v1768_v14, %s3200_s18  ;;  %v2389_v21 = vsel %vm2387_vm11, %v2372_v16, %v2180_v56 }
 0x255   : > { %v4172_v10 = vpop.permute.xlu1 %1925 }
 0x256   : > { %v4174_v15 = vpop.permute.xlu0 %1927 }
 0x258   : > { %1877 = vrot.lane.b32.xlu1 %v1767_v47, %s3194_s9  ;;  %1879 = vrot.lane.b32.xlu0 %v1768_v14, %s3194_s9 }
 0x259   : > { %v2178_v27 = vpop.permute.xlu1 %2177 }
 0x25a   : > { %v4180_v51 = vpop.permute.xlu0 %1801  ;;  %v2388_v44 = vsel %vm2387_vm11, %v2371_v46, %v2178_v27  ;;  %v1754_v29 = vld [vmem:[#allocation2 + $0x99] sm:$0xff]  ;;  %v2291_v27 = vsel %vm1100_vm2, %v3998_v20, %v4145_v57 }
 0x25b   : > { %v4187_v4 = vld [vmem:[#allocation2 + $0x90] sm:$0xff]  ;;  %v4189_v13 = vld [vmem:[#allocation2 + $0x98] sm:$0xff]  ;;  %v2307_v33 = vsel %vm1142_vm4, %v2291_v27, %v4158_v45 }
 0x25c   : > { %2129 = vrot.lane.b32.xlu1 %v4187_v4, %s3202_s12  ;;  %2131 = vrot.lane.b32.xlu0 %v4189_v13, %s3202_s12  ;;  %v1753_v36 = vld [vmem:[#allocation2 + $0x91] sm:$0xff]  ;;  %v1770_v1 = vld [vmem:[#allocation2 + $0x9a] sm:$0xff]  ;;  %v2323_v62 = vsel %vm1184_vm6, %v2307_v33, %v4172_v10 }
 0x25d   : > { %v4200_v9 = vpop.permute.xlu1 %1989  ;;  %v1769_v40 = vld [vmem:[#allocation2 + $0x92] sm:$0xff] }
 0x25e   : > { %v4202_v38 = vpop.permute.xlu0 %2053  ;;  %v2339_v34 = vsel %vm1226_vm8, %v2323_v62, %v4200_v9  ;;  %v2292_v9 = vsel %vm1100_vm2, %v3965_v8, %v4123_v37  ;;  %v2293_v62 = vsel %vm1100_vm2, %v4027_v48, %v4180_v51 }
 0x25f   : > { %v2356_v45 = vsel %vm2353_vm9, %v2339_v34, %v4202_v38  ;;  %v2308_v38 = vsel %vm1142_vm4, %v2292_v9, %v4147_v54 }
 0x260   : > { %1941 = vrot.lane.b32.xlu1 %v4187_v4, %s3196_s15  ;;  %1943 = vrot.lane.b32.xlu0 %v4189_v13, %s3196_s15 }
 0x261   : > { %v2242_v25 = vpop.permute.xlu1 %2241 }
 0x262   : > { %v4215_v42 = vpop.permute.xlu0 %1803  ;;  %v2405_v28 = vsel %vm2404_vm10, %v2388_v44, %v2242_v25  ;;  %v2324_v44 = vsel %vm1184_vm6, %v2308_v38, %v4174_v15 }
 0x263   : > { %3049 = vmatprep.mubr.msk.f32.mxu1 %vm2437_vm12, %v2405_v28  ;;  %v2340_v54 = vsel %vm1226_vm8, %v2324_v44, %v4163_v41  ;;  %v1518_v41 = vadd.s32 8, %v3890_v50 }
 0x264   : > { %2193 = vrot.lane.b32.xlu1 %v1753_v36, %s3201_s28  ;;  %2195 = vrot.lane.b32.xlu0 %v1754_v29, %s3201_s28 }
 0x265   : > { %v2244_v17 = vpop.permute.xlu1 %2243  ;;  %vm1528_vm0 = vcmp.ge.s32.totalorder %v1518_v41, 0  ;;  %vm1538_vm1 = vcmp.lt.s32.totalorder %v1518_v41, 16 }
 0x266   : > { %v4223_v58 = vpop.permute.xlu0 %2055  ;;  %v2406_v0 = vsel %vm2404_vm10, %v2389_v21, %v2244_v17  ;;  %vm1548_vm3 = vmand %vm1528_vm0, %vm1538_vm1 }
 0x267   : > { %3050 = vmatmul.mubr.msk.f32.vlgmr.msra.gmra.mrb[0].mxu1 %vm2437_vm12, %v2406_v0  ;;  %v2357_v15 = vsel %vm2353_vm9, %v2340_v54, %v4223_v58 }
 0x268   : > { %2005 = vrot.lane.b32.xlu1 %v1753_v36, %s3198_s11  ;;  %1817 = vrot.lane.b32.xlu0 %v1753_v36, %s3191_s6 }
 0x269   : > { %v4230_v2 = vpop.permute.xlu1 %1865 }
 0x26a   : > { %v4232_v47 = vpop.permute.xlu0 %1867  ;;  %v2309_v34 = vsel %vm1142_vm4, %v2293_v62, %v4230_v2 }
 0x26c   : > { %2257 = vrot.lane.b32.xlu1 %v1769_v40, %s3203_s27  ;;  %2069 = vrot.lane.b32.xlu0 %v1769_v40, %s3200_s18 }
 0x26d   : > { %v3024_v3 = vpop.f32.mrb[14].mxu0 }
 0x26e   : > { %v1466_v56 = vadd.f32 %v3024_v3, %v3899_v55  ;;  %v1460_v5 = vpop.f32.mrb[15].mxu0  ;;  %v2118_v60 = vpop.permute.xlu1 %2117 }
 0x26f   : > { %v1461_v35 = vadd.f32 %v3899_v55, %v1460_v5  ;;  %v2120_v7 = vpop.permute.xlu0 %2119  ;;  %v2373_v10 = vsel %vm2370_vm7, %v2356_v45, %v2118_v60 }
 0x270   : > { %v1504_v59 = vmax.f32 %v1466_v56, 0.0  ;;  %2007 = vrot.lane.b32.xlu1 %v1754_v29, %s3198_s11  ;;  %1819 = vrot.lane.b32.xlu0 %v1754_v29, %s3191_s6  ;;  %v2374_v28 = vsel %vm2370_vm7, %v2357_v15, %v2120_v7 }
 0x271   : > { %v1503_v12 = vmax.f32 %v1461_v35, 0.0 }
 0x272   : > { %v1585_v63 = vsel %vm1547_vm15, %v1504_v59, 0.0  ;;  %v4241_v14 = vpop.permute.xlu1 %1929 }
 0x273   : > { %1626 = vst.msk [vmem:[#allocation2 + $0xb1] sm:$0xff] %vm1100_vm2, %v1585_v63  ;;  %v1584_v6 = vsel %vm1547_vm15, %v1503_v12, 0.0  ;;  %v4243_v11 = vpop.permute.xlu0 %1931 }
 0x274   : > { %1625 = vst.msk [vmem:[#allocation2 + $0xa9] sm:$0xff] %vm1100_vm2, %v1584_v6  ;;  %2259 = vrot.lane.b32.xlu1 %v1770_v1, %s3203_s27  ;;  %2071 = vrot.lane.b32.xlu0 %v1770_v1, %s3200_s18 }
 0x276   : > { %v2182_v18 = vpop.permute.xlu1 %2181 }
 0x277   : > { %v2184_v19 = vpop.permute.xlu0 %2183  ;;  %v2390_v24 = vsel %vm2387_vm11, %v2373_v10, %v2182_v18  ;;  %v1519_v18 = vadd.s32 9, %v3890_v50  ;;  %v2325_v10 = vsel %vm1184_vm6, %v2309_v34, %v4241_v14 }
 0x278   : > { %1881 = vrot.lane.b32.xlu1 %v1769_v40, %s3194_s9  ;;  %1883 = vrot.lane.b32.xlu0 %v1770_v1, %s3194_s9  ;;  %v2391_v36 = vsel %vm2387_vm11, %v2374_v28, %v2184_v19 }
 0x279   : > { %vm1529_vm5 = vcmp.ge.s32.totalorder %v1519_v18, 0  ;;  %vm1539_vm13 = vcmp.lt.s32.totalorder %v1519_v18, 16 }
 0x27a   : > { %v4259_v32 = vpop.permute.xlu1 %1993  ;;  %v1756_v16 = vld [vmem:[#allocation2 + $0xb1] sm:$0xff]  ;;  %vm4346_vm14 = vmand %vm1529_vm5, %vm1539_vm13 }
 0x27b   : > { %v4261_v22 = vpop.permute.xlu0 %1805  ;;  %v4263_v20 = vld [vmem:[#allocation2 + $0xa8] sm:$0xff]  ;;  %v4265_v57 = vld [vmem:[#allocation2 + $0xb0] sm:$0xff] }
 0x27c   : > { %2133 = vrot.lane.b32.xlu1 %v4263_v20, %s3202_s12  ;;  %2135 = vrot.lane.b32.xlu0 %v4265_v57, %s3202_s12  ;;  %v1755_v25 = vld [vmem:[#allocation2 + $0xa9] sm:$0xff]  ;;  %v1772_v27 = vld [vmem:[#allocation2 + $0xb2] sm:$0xff] }
 0x27d   : > { %v1771_v43 = vld [vmem:[#allocation2 + $0xaa] sm:$0xff] }
 0x27e   : > { %v2246_v39 = vpop.permute.xlu1 %2245 }
 0x27f   : > { %v4278_v46 = vpop.permute.xlu0 %2057  ;;  %v2407_v49 = vsel %vm2404_vm10, %v2390_v24, %v2246_v39  ;;  %v2341_v39 = vsel %vm1226_vm8, %v2325_v10, %v4259_v32  ;;  %v2295_v10 = vsel %vm1100_vm2, %v4063_v23, %v4261_v22 }
 0x280   : > { %1945 = vrot.lane.b32.xlu1 %v4263_v20, %s3196_s15  ;;  %1947 = vrot.lane.b32.xlu0 %v4265_v57, %s3196_s15 }
 0x281   : > { %3052 = vmatprep.mubr.msk.f32.mxu1 %vm2437_vm12, %v2407_v49  ;;  %v2358_v49 = vsel %vm2353_vm9, %v2341_v39, %v4278_v46 }
 0x282   : > { %v4290_v8 = vpop.permute.xlu1 %1995 }
 0x283   : > { %v4292_v37 = vpop.permute.xlu0 %1807 }
 0x284   : > { %2197 = vrot.lane.b32.xlu1 %v1755_v25, %s3201_s28  ;;  %2199 = vrot.lane.b32.xlu0 %v1756_v16, %s3201_s28 }
 0x286   : > { %v2248_v29 = vpop.permute.xlu1 %2247 }
 0x287   : > { %v4302_v17 = vpop.permute.xlu0 %2059  ;;  %v2408_v21 = vsel %vm2404_vm10, %v2391_v36, %v2248_v29 }
 0x288   : > { %2009 = vrot.lane.b32.xlu1 %v1755_v25, %s3198_s11  ;;  %1821 = vrot.lane.b32.xlu0 %v1755_v25, %s3191_s6 }
 0x289   : > { %3053 = vmatmul.mubr.msk.f32.gmra.mrb[2].mxu1 %vm2437_vm12, %v2408_v21 }
 0x28a   : > { %v4309_v58 = vpop.permute.xlu1 %1869 }
 0x28b   : > { %v4311_v0 = vpop.permute.xlu0 %1871 }
 0x28c   : > { %2261 = vrot.lane.b32.xlu1 %v1771_v43, %s3203_s27  ;;  %2073 = vrot.lane.b32.xlu0 %v1771_v43, %s3200_s18 }
 0x28e   : > { %v3027_v40 = vpop.f32.mrb[16].mxu0  ;;  %v2122_v35 = vpop.permute.xlu1 %2121 }
 0x28f   : > { %v1476_v3 = vadd.f32 %v3027_v40, %v3899_v55  ;;  %v1470_v56 = vpop.f32.mrb[17].mxu0  ;;  %v4317_v60 = vpop.permute.xlu0 %2123  ;;  %v2375_v54 = vsel %vm2370_vm7, %v2358_v49, %v2122_v35 }
 0x290   : > { %v1471_v5 = vadd.f32 %v3899_v55, %v1470_v56  ;;  %2011 = vrot.lane.b32.xlu1 %v1756_v16, %s3198_s11  ;;  %1823 = vrot.lane.b32.xlu0 %v1756_v16, %s3191_s6  ;;  %s2770_s6 = sshll.u32 %s4602_s30, 1 }
 0x291   : > { %v1506_v7 = vmax.f32 %v1476_v3, 0.0 }
 0x292   : > { %v1505_v59 = vmax.f32 %v1471_v5, 0.0  ;;  %v4322_v6 = vpop.permute.xlu1 %1933 }
 0x293   : > { %v1587_v12 = vsel %vm1548_vm3, %v1506_v7, 0.0  ;;  %v4324_v1 = vpop.permute.xlu0 %1935 }
 0x294   : > { %1628 = vst.msk [vmem:[#allocation2 + $0xc9] sm:$0xff] %vm1100_vm2, %v1587_v12  ;;  %v1586_v63 = vsel %vm1548_vm3, %v1505_v59, 0.0  ;;  %2263 = vrot.lane.b32.xlu1 %v1772_v27, %s3203_s27  ;;  %2075 = vrot.lane.b32.xlu0 %v1772_v27, %s3200_s18 }
 0x295   : > { %1627 = vst.msk [vmem:[#allocation2 + $0xc1] sm:$0xff] %vm1100_vm2, %v1586_v63 }
 0x296   : > { %v2186_v19 = vpop.permute.xlu1 %2185 }
 0x297   : > { %v2188_v33 = vpop.permute.xlu0 %2187  ;;  %v2392_v25 = vsel %vm2387_vm11, %v2375_v54, %v2186_v19  ;;  %v2296_v54 = vsel %vm1100_vm2, %v4065_v31, %v4292_v37 }
 0x298   : > { %1885 = vrot.lane.b32.xlu1 %v1771_v43, %s3194_s9  ;;  %1887 = vrot.lane.b32.xlu0 %v1772_v27, %s3194_s9  ;;  %s2771_s9 = sshll.u32 %s4600_s19, 5 }
 0x29a   : > { %v4340_v9 = vpop.permute.xlu1 %1997 }
 0x29b   : > { %v3030_v45 = vpop.f32.mrb[18].mxu0  ;;  %v4342_v24 = vpop.permute.xlu0 %1809  ;;  %v1758_v40 = vld [vmem:[#allocation2 + $0xc9] sm:$0xff] }
 0x29c   : > { %v1486_v50 = vadd.f32 %v3030_v45, %v3899_v55  ;;  %v1741_v48 = vld [vmem:[#allocation2 + $0xc0] sm:$0xff]  ;;  %v1742_v51 = vld [vmem:[#allocation2 + $0xc8] sm:$0xff]  ;;  %v1480_v2 = vpop.f32.mrb[19].mxu0 }
 0x29d   : > { %v1481_v44 = vadd.f32 %v3899_v55, %v1480_v2  ;;  %2137 = vrot.lane.b32.xlu1 %v1741_v48, %s3202_s12  ;;  %2139 = vrot.lane.b32.xlu0 %v1742_v51, %s3202_s12  ;;  %v2294_v55 = vsel %vm1100_vm2, %v4029_v61, %v4215_v42  ;;  %v1757_v42 = vld [vmem:[#allocation2 + $0xc1] sm:$0xff]  ;;  %v1774_v59 = vld [vmem:[#allocation2 + $0xca] sm:$0xff] }
 0x29e   : > { %v1508_v14 = vmax.f32 %v1486_v50, 0.0  ;;  %v2250_v15 = vpop.permute.xlu1 %2249  ;;  %v2310_v29 = vsel %vm1142_vm4, %v2294_v55, %v4232_v47  ;;  %v1773_v7 = vld [vmem:[#allocation2 + $0xc2] sm:$0xff]  ;;  %v2311_v50 = vsel %vm1142_vm4, %v2295_v10, %v4309_v58 }
 0x29f   : > { %v1507_v16 = vmax.f32 %v1481_v44, 0.0  ;;  %v2062_v28 = vpop.permute.xlu0 %2061  ;;  %v2409_v46 = vsel %vm2404_vm10, %v2392_v25, %v2250_v15  ;;  %v2326_v21 = vsel %vm1184_vm6, %v2310_v29, %v4243_v11 }
 0x2a0   : > { %v1589_v32 = vsel %vm4346_vm14, %v1508_v14, 0.0  ;;  %3055 = vmatprep.mubr.msk.f32.mxu1 %vm2437_vm12, %v2409_v46  ;;  %v2342_v61 = vsel %vm1226_vm8, %v2326_v21, %v4290_v8 }
 0x2a1   : > { %1630 = vst.msk [vmem:[#allocation2 + $0xe1] sm:$0xff] %vm1100_vm2, %v1589_v32  ;;  %v1588_v36 = vsel %vm4346_vm14, %v1507_v16, 0.0  ;;  %1949 = vrot.lane.b32.xlu1 %v1741_v48, %s3196_s15  ;;  %1951 = vrot.lane.b32.xlu0 %v1742_v51, %s3196_s15  ;;  %v2359_v3 = vsel %vm2353_vm9, %v2342_v61, %v4302_v17  ;;  %v2327_v48 = vsel %vm1184_vm6, %v2311_v50, %v4322_v6  ;;  %s246_s15 = sadd.s32 %s2771_s9, %s2770_s6 }
 0x2a2   : > { %1629 = vst.msk [vmem:[#allocation2 + $0xd9] sm:$0xff] %vm1100_vm2, %v1588_v36  ;;  %v2000_v41 = vpop.permute.xlu1 %1999  ;;  %v2376_v47 = vsel %vm2370_vm7, %v2359_v3, %v4317_v60  ;;  %v2343_v38 = vsel %vm1226_vm8, %v2327_v48, %v4340_v9  ;;  %v2312_v9 = vsel %vm1142_vm4, %v2296_v54, %v4311_v0  ;;  %v2297_v3 = vsel %vm1100_vm2, %v4092_v26, %v4342_v24 }
 0x2a3   : > { %v4374_v43 = vpop.permute.xlu0 %1811  ;;  %v2393_v11 = vsel %vm2387_vm11, %v2376_v47, %v2188_v33  ;;  %v2360_v49 = vsel %vm2353_vm9, %v2343_v38, %v2062_v28  ;;  %v2328_v25 = vsel %vm1184_vm6, %v2312_v9, %v4324_v1 }
 0x2a4   : > { %v2344_v15 = vsel %vm1226_vm8, %v2328_v25, %v2000_v41  ;;  %v2298_v26 = vsel %vm1100_vm2, %v4094_v30, %v4374_v43 }
 0x2a5   : > { %2201 = vrot.lane.b32.xlu1 %v1757_v42, %s3201_s28  ;;  %2203 = vrot.lane.b32.xlu0 %v1758_v40, %s3201_s28 }
 0x2a6   : > { %v2252_v56 = vpop.permute.xlu1 %2251 }
 0x2a7   : > { %v2064_v5 = vpop.permute.xlu0 %2063  ;;  %v2410_v35 = vsel %vm2404_vm10, %v2393_v11, %v2252_v56 }
 0x2a8   : > { %3056 = vmatmul.mubr.msk.f32.gmra.mrb[4].mxu1 %vm2437_vm12, %v2410_v35  ;;  %v1760_v2 = vld [vmem:[#allocation2 + $0xe1] sm:$0xff]  ;;  %v2361_v28 = vsel %vm2353_vm9, %v2344_v15, %v2064_v5 }
 0x2a9   : > { %2013 = vrot.lane.b32.xlu1 %v1757_v42, %s3198_s11  ;;  %2015 = vrot.lane.b32.xlu0 %v1758_v40, %s3198_s11  ;;  %v1743_v63 = vld [vmem:[#allocation2 + $0xd8] sm:$0xff]  ;;  %v1744_v34 = vld [vmem:[#allocation2 + $0xe0] sm:$0xff] }
 0x2aa   : > { %v1874_v8 = vpop.permute.xlu1 %1873  ;;  %v1759_v19 = vld [vmem:[#allocation2 + $0xd9] sm:$0xff]  ;;  %v1776_v6 = vld [vmem:[#allocation2 + $0xe2] sm:$0xff] }
 0x2ab   : > { %v4389_v17 = vpop.permute.xlu0 %1875  ;;  %v1775_v45 = vld [vmem:[#allocation2 + $0xda] sm:$0xff]  ;;  %v2313_v47 = vsel %vm1142_vm4, %v2297_v3, %v1874_v8 }
 0x2ac   : > { %v2314_v24 = vsel %vm1142_vm4, %v2298_v26, %v4389_v17 }
 0x2ad   : > { %2265 = vrot.lane.b32.xlu1 %v1773_v7, %s3203_s27  ;;  %2267 = vrot.lane.b32.xlu0 %v1774_v59, %s3203_s27 }
 0x2ae   : > { %v2126_v60 = vpop.permute.xlu1 %2125 }
 0x2af   : > { %v2128_v12 = vpop.permute.xlu0 %2127  ;;  %v2377_v23 = vsel %vm2370_vm7, %v2360_v49, %v2126_v60 }
 0x2b0   : > { %v2378_v46 = vsel %vm2370_vm7, %v2361_v28, %v2128_v12 }
 0x2b1   : > { %2077 = vrot.lane.b32.xlu1 %v1773_v7, %s3200_s18  ;;  %2141 = vrot.lane.b32.xlu0 %v1743_v63, %s3202_s12 }
 0x2b2   : > { %v1938_v27 = vpop.permute.xlu1 %1937 }
 0x2b3   : > { %v4395_v18 = vpop.permute.xlu0 %1939  ;;  %v2329_v11 = vsel %vm1184_vm6, %v2313_v47, %v1938_v27 }
 0x2b4   : > { %v2330_v8 = vsel %vm1184_vm6, %v2314_v24, %v4395_v18 }
 0x2b5   : > { %2079 = vrot.lane.b32.xlu1 %v1774_v59, %s3200_s18  ;;  %2205 = vrot.lane.b32.xlu0 %v1759_v19, %s3201_s28 }
 0x2b6   : > { %v2190_v33 = vpop.permute.xlu1 %2189 }
 0x2b7   : > { %v2192_v62 = vpop.permute.xlu0 %2191  ;;  %v2394_v22 = vsel %vm2387_vm11, %v2377_v23, %v2190_v33 }
 0x2b8   : > { %v2395_v31 = vsel %vm2387_vm11, %v2378_v46, %v2192_v62 }
 0x2b9   : > { %2143 = vrot.lane.b32.xlu1 %v1744_v34, %s3202_s12  ;;  %2269 = vrot.lane.b32.xlu0 %v1775_v45, %s3203_s27 }
 0x2ba   : > { %v2002_v51 = vpop.permute.xlu1 %2001 }
 0x2bb   : > { %v4408_v39 = vpop.permute.xlu0 %1813  ;;  %v2345_v35 = vsel %vm1226_vm8, %v2329_v11, %v2002_v51 }
 0x2bd   : > { %2207 = vrot.lane.b32.xlu1 %v1760_v2, %s3201_s28  ;;  %s2772_s28 = sshll.u32 %s246_s15, 3 }
 0x2be   : > { %v2254_v14 = vpop.permute.xlu1 %2253  ;;  %s4532_s8 = scalar_lea.vmem %s4586_s5, %s2772_s28 }
 0x2bf   : > { %v2066_v58 = vpop.permute.xlu0 %2065  ;;  %v2411_v44 = vsel %vm2404_vm10, %v2394_v22, %v2254_v14  ;;  %v2299_v22 = vsel %vm1100_vm2, %v4137_v52, %v4408_v39 }
 0x2c0   : > { %3058 = vmatprep.mubr.msk.f32.mxu1 %vm2437_vm12, %v2411_v44  ;;  %v2362_v7 = vsel %vm2353_vm9, %v2345_v35, %v2066_v58 }
 0x2c1   : > { %2271 = vrot.lane.b32.xlu1 %v1776_v6, %s3203_s27 }
 0x2c2   : > { %v2004_v32 = vpop.permute.xlu1 %2003 }
 0x2c3   : > { %v4426_v16 = vpop.permute.xlu0 %1815  ;;  %v2346_v62 = vsel %vm1226_vm8, %v2330_v8, %v2004_v32 }
 0x2c4   : > { %v2300_v52 = vsel %vm1100_vm2, %v4139_v53, %v4426_v16 }
 0x2c6   : > { %v2256_v37 = vpop.permute.xlu1 %2255 }
 0x2c7   : > { %v2068_v55 = vpop.permute.xlu0 %2067  ;;  %v2412_v36 = vsel %vm2404_vm10, %v2395_v31, %v2256_v37 }
 0x2c8   : > { %3059 = vmatmul.mubr.msk.f32.gmra.mrb[6].mxu1 %vm2437_vm12, %v2412_v36  ;;  %v2363_v34 = vsel %vm2353_vm9, %v2346_v62, %v2068_v55 }
 0x2ca   : > { %v1878_v0 = vpop.permute.xlu1 %1877 }
 0x2cb   : > { %v1880_v29 = vpop.permute.xlu0 %1879  ;;  %v2315_v14 = vsel %vm1142_vm4, %v2299_v22, %v1878_v0 }
 0x2cc   : > { %v2316_v39 = vsel %vm1142_vm4, %v2300_v52, %v1880_v29  ;;  %v2922_v52 = vld [vmem:[%s4585_s4] ss:$0 sm:$0xff] }
 0x2ce   : > { %v2130_v1 = vpop.permute.xlu1 %2129 }
 0x2cf   : > { %v2132_v21 = vpop.permute.xlu0 %2131  ;;  %v2379_v59 = vsel %vm2370_vm7, %v2362_v7, %v2130_v1 }
 0x2d0   : > { %v2380_v45 = vsel %vm2370_vm7, %v2363_v34, %v2132_v21 }
 0x2d2   : > { %v1942_v61 = vpop.permute.xlu1 %1941 }
 0x2d3   : > { %v1944_v42 = vpop.permute.xlu0 %1943  ;;  %v2331_v58 = vsel %vm1184_vm6, %v2315_v14, %v1942_v61 }
 0x2d4   : > { %v2332_v31 = vsel %vm1184_vm6, %v2316_v39, %v1944_v42 }
 0x2d6   : > { %v2194_v40 = vpop.permute.xlu1 %2193 }
 0x2d7   : > { %v2196_v41 = vpop.permute.xlu0 %2195  ;;  %v2396_v60 = vsel %vm2387_vm11, %v2379_v59, %v2194_v40 }
 0x2d8   : > { %v2397_v10 = vsel %vm2387_vm11, %v2380_v45, %v2196_v41 }
 0x2da   : > { %v2006_v56 = vpop.permute.xlu1 %2005 }
 0x2db   : > { %v4439_v5 = vpop.permute.xlu0 %1817  ;;  %v2347_v54 = vsel %vm1226_vm8, %v2331_v58, %v2006_v56 }
 0x2dc   : > { %v2301_v35 = vsel %vm1100_vm2, %v4187_v4, %v4439_v5 }
 0x2de   : > { %v2258_v12 = vpop.permute.xlu1 %2257 }
 0x2df   : > { %v2070_v63 = vpop.permute.xlu0 %2069  ;;  %v2413_v19 = vsel %vm2404_vm10, %v2396_v60, %v2258_v12 }
 0x2e0   : > { %3061 = vmatprep.mubr.msk.f32.mxu1 %vm2437_vm12, %v2413_v19  ;;  %v2364_v9 = vsel %vm2353_vm9, %v2347_v54, %v2070_v63 }
 0x2e2   : > { %v2008_v27 = vpop.permute.xlu1 %2007 }
 0x2e3   : > { %v1820_v33 = vpop.permute.xlu0 %1819  ;;  %v2348_v36 = vsel %vm1226_vm8, %v2332_v31, %v2008_v27 }
 0x2e4   : > { %v2302_v7 = vsel %vm1100_vm2, %v4189_v13, %v1820_v33 }
 0x2e6   : > { %v2260_v50 = vpop.permute.xlu1 %2259 }
 0x2e7   : > { %v2072_v30 = vpop.permute.xlu0 %2071  ;;  %v2414_v43 = vsel %vm2404_vm10, %v2397_v10, %v2260_v50 }
 0x2e8   : > { %3062 = vmatmul.mubr.msk.f32.gmra.mrb[8].mxu1 %vm2437_vm12, %v2414_v43  ;;  %v2365_v0 = vsel %vm2353_vm9, %v2348_v36, %v2072_v30 }
 0x2ea   : > { %v1882_v17 = vpop.permute.xlu1 %1881 }
 0x2eb   : > { %v1884_v48 = vpop.permute.xlu0 %1883  ;;  %v2317_v59 = vsel %vm1142_vm4, %v2301_v35, %v1882_v17 }
 0x2ec   : > { %v2318_v60 = vsel %vm1142_vm4, %v2302_v7, %v1884_v48 }
 0x2ee   : > { %v2134_v51 = vpop.permute.xlu1 %2133 }
 0x2ef   : > { %v2136_v18 = vpop.permute.xlu0 %2135  ;;  %v2381_v25 = vsel %vm2370_vm7, %v2364_v9, %v2134_v51 }
 0x2f0   : > { %v2382_v1 = vsel %vm2370_vm7, %v2365_v0, %v2136_v18 }
 0x2f2   : > { %v1946_v38 = vpop.permute.xlu1 %1945 }
 0x2f3   : > { %v1948_v2 = vpop.permute.xlu0 %1947  ;;  %v2333_v12 = vsel %vm1184_vm6, %v2317_v59, %v1946_v38 }
 0x2f4   : > { %v2334_v63 = vsel %vm1184_vm6, %v2318_v60, %v1948_v2 }
 0x2f6   : > { %v2198_v49 = vpop.permute.xlu1 %2197 }
 0x2f7   : > { %v2200_v23 = vpop.permute.xlu0 %2199  ;;  %v2398_v32 = vsel %vm2387_vm11, %v2381_v25, %v2198_v49 }
 0x2f8   : > { %v2399_v21 = vsel %vm2387_vm11, %v2382_v1, %v2200_v23 }
 0x2fa   : > { %v2010_v44 = vpop.permute.xlu1 %2009 }
 0x2fb   : > { %v1822_v6 = vpop.permute.xlu0 %1821  ;;  %v2349_v24 = vsel %vm1226_vm8, %v2333_v12, %v2010_v44 }
 0x2fc   : > { %v2303_v30 = vsel %vm1100_vm2, %v4263_v20, %v1822_v6 }
 0x2fe   : > { %v2262_v15 = vpop.permute.xlu1 %2261 }
 0x2ff   : > { %v2074_v28 = vpop.permute.xlu0 %2073  ;;  %v2415_v46 = vsel %vm2404_vm10, %v2398_v32, %v2262_v15 }
 0x300   : > { %3064 = vmatprep.mubr.msk.f32.mxu1 %vm2437_vm12, %v2415_v46  ;;  %v2366_v27 = vsel %vm2353_vm9, %v2349_v24, %v2074_v28 }
 0x302   : > { %v2012_v37 = vpop.permute.xlu1 %2011 }
 0x303   : > { %v1824_v55 = vpop.permute.xlu0 %1823  ;;  %v2350_v8 = vsel %vm1226_vm8, %v2334_v63, %v2012_v37 }
 0x304   : > { %v2304_v44 = vsel %vm1100_vm2, %v4265_v57, %v1824_v55 }
 0x306   : > { %v2264_v61 = vpop.permute.xlu1 %2263 }
 0x307   : > { %v2076_v40 = vpop.permute.xlu0 %2075  ;;  %v2416_v53 = vsel %vm2404_vm10, %v2399_v21, %v2264_v61 }
 0x308   : > { %3065 = vmatmul.mubr.msk.f32.gmra.mrb[10].mxu1 %vm2437_vm12, %v2416_v53  ;;  %v2367_v4 = vsel %vm2353_vm9, %v2350_v8, %v2076_v40 }
 0x30a   : > { %v1886_v16 = vpop.permute.xlu1 %1885 }
 0x30b   : > { %v1888_v29 = vpop.permute.xlu0 %1887  ;;  %v2319_v48 = vsel %vm1142_vm4, %v2303_v30, %v1886_v16 }
 0x30c   : > { %v2320_v6 = vsel %vm1142_vm4, %v2304_v44, %v1888_v29 }
 0x30f   : > { %v2138_v41 = vpop.permute.xlu1 %2137  ;;  %v2140_v42 = vpop.permute.xlu0 %2139 }
 0x310   : > { %v2383_v13 = vsel %vm2370_vm7, %v2366_v27, %v2138_v41  ;;  %v2384_v5 = vsel %vm2370_vm7, %v2367_v4, %v2140_v42 }
 0x313   : > { %v1950_v3 = vpop.permute.xlu1 %1949  ;;  %v1952_v47 = vpop.permute.xlu0 %1951 }
 0x314   : > { %v2335_v51 = vsel %vm1184_vm6, %v2319_v48, %v1950_v3  ;;  %v2336_v54 = vsel %vm1184_vm6, %v2320_v6, %v1952_v47 }
 0x317   : > { %v2202_v11 = vpop.permute.xlu1 %2201  ;;  %v2204_v56 = vpop.permute.xlu0 %2203 }
 0x318   : > { %v2400_v33 = vsel %vm2387_vm11, %v2383_v13, %v2202_v11  ;;  %v2401_v62 = vsel %vm2387_vm11, %v2384_v5, %v2204_v56 }
 0x31b   : > { %v2014_v19 = vpop.permute.xlu1 %2013  ;;  %v2016_v26 = vpop.permute.xlu0 %2015 }
 0x31c   : > { %v2351_v18 = vsel %vm1226_vm8, %v2335_v51, %v2014_v19  ;;  %v2352_v25 = vsel %vm1226_vm8, %v2336_v54, %v2016_v26 }
 0x31f   : > { %v2266_v34 = vpop.permute.xlu1 %2265  ;;  %v2268_v45 = vpop.permute.xlu0 %2267 }
 0x320   : > { %v2417_v10 = vsel %vm2404_vm10, %v2400_v33, %v2266_v34  ;;  %v2418_v50 = vsel %vm2404_vm10, %v2401_v62, %v2268_v45 }
 0x321   : > { %3067 = vmatprep.mubr.msk.f32.mxu1 %vm2437_vm12, %v2417_v10 }
 0x322   : > { %3068 = vmatmul.mubr.msk.f32.gmra.mrb[12].mxu1 %vm2437_vm12, %v2418_v50 }
 0x323   : > { %v2078_v43 = vpop.permute.xlu1 %2077  ;;  %v2142_v17 = vpop.permute.xlu0 %2141 }
 0x324   : > { %v2368_v38 = vsel %vm2353_vm9, %v2351_v18, %v2078_v43 }
 0x325   : > { %v2385_v23 = vsel %vm2370_vm7, %v2368_v38, %v2142_v17 }
 0x327   : > { %v2080_v2 = vpop.permute.xlu1 %2079  ;;  %v2206_v49 = vpop.permute.xlu0 %2205 }
 0x328   : > { %v2402_v22 = vsel %vm2387_vm11, %v2385_v23, %v2206_v49  ;;  %v2369_v32 = vsel %vm2353_vm9, %v2352_v25, %v2080_v2 }
 0x32b   : > { %v2144_v14 = vpop.permute.xlu1 %2143  ;;  %v2270_v20 = vpop.permute.xlu0 %2269 }
 0x32c   : > { %v2419_v58 = vsel %vm2404_vm10, %v2402_v22, %v2270_v20  ;;  %v2386_v15 = vsel %vm2370_vm7, %v2369_v32, %v2144_v14 }
 0x32d   : > { %3070 = vmatprep.mubr.msk.f32.mxu1 %vm2437_vm12, %v2419_v58 }
 0x32f   : > { %v2208_v9 = vpop.permute.xlu1 %2207 }
 0x330   : > { %v2403_v28 = vsel %vm2387_vm11, %v2386_v15, %v2208_v9 }
 0x333   : > { %v2272_v46 = vpop.permute.xlu1 %2271 }
 0x334   : > { %v2420_v57 = vsel %vm2404_vm10, %v2403_v28, %v2272_v46 }
 0x335   : > { %3071 = vmatmul.mubr.msk.f32.gmra.mrb[14].mxu1 %vm2437_vm12, %v2420_v57 }
 0x33a   : > { %v3051_v39 = vpop.f32.mrb[0].mxu1 }
 0x33b   : > { %v2558_v31 = vadd.f32 %v3051_v39, %v2922_v52  ;;  %v2552_v37 = vpop.f32.mrb[1].mxu1 }
 0x33c   : > { %v2553_v55 = vadd.f32 %v2922_v52, %v2552_v37 }
 0x33d   : > { %v2632_v36 = vmax.f32 %v2558_v31, 0.0 }
 0x33e   : > { %v2631_v0 = vmax.f32 %v2553_v55, 0.0 }
 0x33f   : > { %2648 = vst.msk [vmem:[%s4532_s8 + $0x8] sm:$0xff] %vm1100_vm2, %v2632_v36 }
 0x340   : > { %2647 = vst.msk [vmem:[%s4532_s8] sm:$0xff] %vm1100_vm2, %v2631_v0 }
 0x35c   : > { %v3054_v1 = vpop.f32.mrb[2].mxu1 }
 0x35d   : > { %v2568_v21 = vadd.f32 %v3054_v1, %v2922_v52  ;;  %v2562_v61 = vpop.f32.mrb[3].mxu1 }
 0x35e   : > { %v2563_v40 = vadd.f32 %v2922_v52, %v2562_v61 }
 0x35f   : > { %v2634_v53 = vmax.f32 %v2568_v21, 0.0 }
 0x360   : > { %v2633_v16 = vmax.f32 %v2563_v40, 0.0 }
 0x361   : > { %2650 = vst.msk [vmem:[%s4532_s8 + $0x18] sm:$0xff] %vm1100_vm2, %v2634_v53 }
 0x362   : > { %2649 = vst.msk [vmem:[%s4532_s8 + $0x10] sm:$0xff] %vm1100_vm2, %v2633_v16 }
 0x37b   : > { %v3057_v29 = vpop.f32.mrb[4].mxu1 }
 0x37c   : > { %v2578_v41 = vadd.f32 %v3057_v29, %v2922_v52  ;;  %v2572_v42 = vpop.f32.mrb[5].mxu1 }
 0x37d   : > { %v2573_v3 = vadd.f32 %v2922_v52, %v2572_v42 }
 0x37e   : > { %v2636_v47 = vmax.f32 %v2578_v41, 0.0 }
 0x37f   : > { %v2635_v11 = vmax.f32 %v2573_v3, 0.0 }
 0x380   : > { %2652 = vst.msk [vmem:[%s4532_s8 + $0x28] sm:$0xff] %vm1100_vm2, %v2636_v47 }
 0x381   : > { %2651 = vst.msk [vmem:[%s4532_s8 + $0x20] sm:$0xff] %vm1100_vm2, %v2635_v11 }
 0x39b   : > { %v3060_v56 = vpop.f32.mrb[6].mxu1 }
 0x39c   : > { %v2588_v35 = vadd.f32 %v3060_v56, %v2922_v52  ;;  %v2582_v7 = vpop.f32.mrb[7].mxu1 }
 0x39d   : > { %v2583_v59 = vadd.f32 %v2922_v52, %v2582_v7 }
 0x39e   : > { %v2638_v60 = vmax.f32 %v2588_v35, 0.0 }
 0x39f   : > { %v2637_v12 = vmax.f32 %v2583_v59, 0.0 }
 0x3a0   : > { %2654 = vst.msk [vmem:[%s4532_s8 + $0x38] sm:$0xff] %vm1100_vm2, %v2638_v60 }
 0x3a1   : > { %2653 = vst.msk [vmem:[%s4532_s8 + $0x30] sm:$0xff] %vm1100_vm2, %v2637_v12 }
 0x3bb   : > { %v3063_v63 = vpop.f32.mrb[8].mxu1 }
 0x3bc   : > { %v2598_v19 = vadd.f32 %v3063_v63, %v2922_v52  ;;  %v2592_v26 = vpop.f32.mrb[9].mxu1 }
 0x3bd   : > { %v2593_v24 = vadd.f32 %v2922_v52, %v2592_v26 }
 0x3be   : > { %v2640_v8 = vmax.f32 %v2598_v19, 0.0 }
 0x3bf   : > { %v2639_v27 = vmax.f32 %v2593_v24, 0.0 }
 0x3c0   : > { %2656 = vst.msk [vmem:[%s4532_s8 + $0x48] sm:$0xff] %vm1100_vm2, %v2640_v8 }
 0x3c1   : > { %2655 = vst.msk [vmem:[%s4532_s8 + $0x40] sm:$0xff] %vm1100_vm2, %v2639_v27 }
 0x3db   : > { %v3066_v4 = vpop.f32.mrb[10].mxu1 }
 0x3dc   : > { %v2608_v13 = vadd.f32 %v3066_v4, %v2922_v52  ;;  %v2602_v5 = vpop.f32.mrb[11].mxu1 }
 0x3dd   : > { %v2603_v33 = vadd.f32 %v2922_v52, %v2602_v5 }
 0x3de   : > { %v2642_v62 = vmax.f32 %v2608_v13, 0.0 }
 0x3df   : > { %v2641_v34 = vmax.f32 %v2603_v33, 0.0 }
 0x3e0   : > { %2658 = vst.msk [vmem:[%s4532_s8 + $0x58] sm:$0xff] %vm1100_vm2, %v2642_v62 }
 0x3e1   : > { %2657 = vst.msk [vmem:[%s4532_s8 + $0x50] sm:$0xff] %vm1100_vm2, %v2641_v34 }
 0x3f5   : > { %v3069_v45 = vpop.f32.mrb[12].mxu1 }
 0x3f6   : > { %v2618_v10 = vadd.f32 %v3069_v45, %v2922_v52  ;;  %v2612_v50 = vpop.f32.mrb[13].mxu1 }
 0x3f7   : > { %v2613_v30 = vadd.f32 %v2922_v52, %v2612_v50 }
 0x3f8   : > { %v2644_v43 = vmax.f32 %v2618_v10, 0.0 }
 0x3f9   : > { %v2643_v17 = vmax.f32 %v2613_v30, 0.0 }
 0x3fa   : > { %2660 = vst.msk [vmem:[%s4532_s8 + $0x68] sm:$0xff] %vm1100_vm2, %v2644_v43 }
 0x3fb   : > { %2659 = vst.msk [vmem:[%s4532_s8 + $0x60] sm:$0xff] %vm1100_vm2, %v2643_v17 }
 0x408   : > { %v3072_v48 = vpop.f32.mrb[14].mxu1 }
 0x409   : > { %v2628_v51 = vadd.f32 %v3072_v48, %v2922_v52  ;;  %v2622_v18 = vpop.f32.mrb[15].mxu1 }
 0x40a   : > { %v2623_v38 = vadd.f32 %v2922_v52, %v2622_v18 }
 0x40b   : > { %v2646_v2 = vmax.f32 %v2628_v51, 0.0 }
 0x40c   : > { %v2645_v49 = vmax.f32 %v2623_v38, 0.0 }
 0x40d   : > { %2662 = vst.msk [vmem:[%s4532_s8 + $0x78] sm:$0xff] %vm1100_vm2, %v2646_v2 }
 0x40e   : > { %2661 = vst.msk [vmem:[%s4532_s8 + $0x70] sm:$0xff] %vm1100_vm2, %v2645_v49 }
 0x40f PF: > { %s15_s22 = sadd.s32 1, %s3189_s22   ;;  %s4589_s18 = smov %s3181_s20 }
 0x410   : > { %p12_p7 = scmp.ge.s32.totalorder %s15_s22, 6   ;;  %s4590_s19 = smov %s3185_s21 }
 0x411   : > { %s4591_s20 = smov %s4594_s23  ;;  %s4592_s21 = smov %s4598_s24 }
 0x412   :  { %14 = sbr.rel (!%p12_p7) target bundleno = 3 (0x3), region = 75 }

</bundles_post_ra>
